<compile_context>
chip_gen: v5e
topology: v5e:2x2
jax: 0.10.0
libtpu: 0.0.40
codegen_flags: <defaults>
</compile_context>

<pallas_src>
import functools
import math

import jax
import jax.numpy as jnp
from jax.experimental import pallas as pl
from jax.experimental.pallas import tpu as pltpu

EPS = 1e-12


# ----------------------------------------------------------------------------
# Fused kernel.  One grid step processes NB batch elements packed side by side
# on the lane axis (L = NB * P_seg lanes, multiple of 128); everything stays in
# VMEM.  Layout: channels on sublanes, (packed) spatial positions on lanes.
# ----------------------------------------------------------------------------
def singe_fused_kernel(x_ref, mask_ref, band_ref, w9_ref, bconv_ref, cent_ref,
                       wfc_ref, bfc_ref, w1f_ref, w1u_ref, b1_ref, w2_ref,
                       b2_ref, out_ref, slab_ref, *, NB, P_seg, P_real, W):
    C = band_ref.shape[0]
    K = bconv_ref.shape[0]
    L = x_ref.shape[2]                       # NB * P_seg  (multiple of 128)

    x = x_ref[0]                             # (C, L) f32

    # ---- ECA #1: per-element global avg pool -> conv1d(k=5) as a banded
    #      (C,C) matmul (f32, torch parity) -> sigmoid scale.  All NB elements
    #      share one matmul (columns = elements).
    pooled = jnp.concatenate(
        [jnp.sum(x[:, ei * P_seg:(ei + 1) * P_seg], axis=1, keepdims=True)
         for ei in range(NB)], axis=1) * (1.0 / P_real)                 # (C, NB)
    s1 = jax.nn.sigmoid(jnp.dot(band_ref[...], pooled,
                                preferred_element_type=jnp.float32))    # (C, NB)
    s1_full = jnp.concatenate(
        [jnp.broadcast_to(s1[:, ei:ei + 1], (C, P_seg)) for ei in range(NB)],
        axis=1)                                                         # (C, L)
    f = x * s1_full

    # ---- channel-wise L2 normalisation (torch F.normalize, dim=1)
    xn = f * jax.lax.rsqrt(
        jnp.maximum(jnp.sum(f * f, axis=0, keepdims=True), EPS * EPS))

    # ---- 3x3 conv taps: lane-rotate (XLU), mask in f32, cast per tap to bf16
    #      and store straight into the (9C, L) bf16 VMEM slab scratch.
    t = 0
    for dh in (-1, 0, 1):
        for dw in (-1, 0, 1):
            off = dh * W + dw
            src = xn if off == 0 else pltpu.roll(xn, (-off) % L, 1)
            slab_ref[t * C:(t + 1) * C, :] = (
                src * mask_ref[t:t + 1, :]).astype(jnp.bfloat16)
            t += 1

    # ---- prototype logits: ONE (K, 9C) @ (9C, L) MXU matmul, then softmax
    logits = jnp.dot(w9_ref[...], slab_ref[...],
                     preferred_element_type=jnp.float32) + bconv_ref[...]
    e = jnp.exp(logits - jnp.max(logits, axis=0, keepdims=True))
    a = e * pl.reciprocal(jnp.sum(e, axis=0, keepdims=True), approx=True)
    a = a * mask_ref[9:10, :]                # zero lane-padding columns

    # ---- per-element VLAD residual aggregation + norms, flattened to (1, K*C)
    #      lane rows (k-major, same ordering as torch .view(N, -1)).
    a16 = a.astype(jnp.bfloat16)
    xn16 = xn.astype(jnp.bfloat16)
    cent = cent_ref[...]
    flat_rows = []
    for ei in range(NB):
        sl = slice(ei * P_seg, (ei + 1) * P_seg)
        up = jax.lax.dot_general(a16[:, sl], xn16[:, sl],
                                 (((1,), (1,)), ((), ())),
                                 preferred_element_type=jnp.float32)    # (K, C)
        asum = jnp.sum(a[:, sl], axis=1, keepdims=True)                 # (K, 1)
        up = up - asum * cent
        up = up * jax.lax.rsqrt(
            jnp.maximum(jnp.sum(up * up, axis=1, keepdims=True), EPS * EPS))
        tot = jnp.sum(jnp.sum(up * up, axis=1, keepdims=True),
                      axis=0, keepdims=True)
        up = up * jax.lax.rsqrt(jnp.maximum(tot, EPS * EPS))
        flat_rows.append(
            jnp.concatenate([up[k:k + 1, :] for k in range(K)], axis=1))
    up_all = jnp.concatenate(flat_rows, axis=0).astype(jnp.bfloat16)    # (NB, KC)

    # ---- Linear(K*C -> C): ONE MXU contraction for all packed elements
    y = jax.lax.dot_general(wfc_ref[...], up_all, (((1,), (1,)), ((), ())),
                            preferred_element_type=jnp.float32) \
        + bfc_ref[...]                                                  # (C, NB)

    # ---- ECA #2 folded in: the up map is spatially constant, so its global
    #      average pool IS y.  Banded conv in f32 (torch parity).
    u = y * jax.nn.sigmoid(jnp.dot(band_ref[...], y,
                                   preferred_element_type=jnp.float32)) # (C, NB)

    # ---- transform: cat(feature, up) -> 1x1 conv -> ReLU -> 1x1 conv -> ReLU.
    #      The up half of the concat is spatially constant per element, so its
    #      contribution is a per-element column broadcast over its lanes.
    t_up = jnp.dot(w1u_ref[...], u.astype(jnp.bfloat16),
                   preferred_element_type=jnp.float32)                  # (C, NB)
    t_full = jnp.concatenate(
        [jnp.broadcast_to(t_up[:, ei:ei + 1], (C, P_seg)) for ei in range(NB)],
        axis=1)                                                         # (C, L)
    h = jnp.maximum(jnp.dot(w1f_ref[...], f.astype(jnp.bfloat16),
                            preferred_element_type=jnp.float32)
                    + t_full + b1_ref[...], 0.0)
    o = jnp.maximum(jnp.dot(w2_ref[...], h.astype(jnp.bfloat16),
                            preferred_element_type=jnp.float32)
                    + b2_ref[...], 0.0)
    out_ref[0] = o * mask_ref[9:10, :]       # keep lane-padding columns at zero


# ----------------------------------------------------------------------------
# Wrapper: parameter prep, batch-to-lane packing, and the single pallas_call.
# ----------------------------------------------------------------------------
def build_band(w_eca, C):
    # banded (C, C) matrix equivalent to Conv1d(1,1,k=5,pad=2,bias=False)
    i = jnp.arange(C)[:, None]
    j = jnp.arange(C)[None, :]
    d = j - i + 2
    valid = (d >= 0) & (d <= 4)
    return jnp.where(valid, w_eca[jnp.clip(d, 0, 4)], 0.0).astype(jnp.float32)


def build_masks(H, W, P, P_seg, nb):
    # Rows 0..8: validity of the 9 spatial taps for every packed lane column.
    # Row 9   : lane column maps to a real pixel (not lane padding).
    L = nb * P_seg
    q = jnp.arange(L) % P_seg
    col_ok = q < P
    hh = q // W
    ww = q % W
    rows = []
    for dh in (-1, 0, 1):
        for dw in (-1, 0, 1):
            rows.append(col_ok & (hh + dh >= 0) & (hh + dh < H)
                        & (ww + dw >= 0) & (ww + dw < W))
    rows.append(col_ok)
    return jnp.stack(rows, axis=0).astype(jnp.float32)          # (10, L)


def _default_nb(N, P):
    # Pack as many batch elements as fit in 128 lanes per grid step (pow2).
    if P >= 128:
        return 1
    nb = 1
    while nb * 2 <= min(N, 128 // P):
        nb *= 2
    return nb


def singe_prototype_forward(feature, params, *, nb=None):
    N, C, H, W = feature.shape
    P = H * W
    K = params["centroids"].shape[0]

    # ---- batch-to-lane packing geometry -------------------------------------
    nb = _default_nb(N, P) if nb is None else max(1, min(int(nb), N))
    m = 128 // math.gcd(nb, 128)
    P_seg = pl.cdiv(P, m) * m                 # per-element lane segment
    L = nb * P_seg                            # lane-dense step width (mult. 128)
    G = pl.cdiv(N, nb)                        # grid steps
    pad_n = G * nb - N

    # ---- parameter prep: matmul weights pre-cast to bf16; biases, centroids
    #      and the tiny banded-ECA matrix stay f32 ----------------------------
    band = build_band(params["eca_w"], C)                                  # (C, C)
    w9 = jnp.transpose(params["netup_w"], (0, 2, 3, 1)).reshape(K, 9 * C)
    w9 = w9.astype(jnp.bfloat16)                                           # (K, 9C)
    bconv = params["netup_b"].reshape(K, 1).astype(jnp.float32)
    wfc = params["upfc_w"].astype(jnp.bfloat16)                            # (C, K*C)
    bfc = params["upfc_b"].reshape(C, 1).astype(jnp.float32)
    w1f = params["t1_w"][:, :C].astype(jnp.bfloat16)
    w1u = params["t1_w"][:, C:].astype(jnp.bfloat16)
    b1 = params["t1_b"].reshape(C, 1).astype(jnp.float32)
    w2 = params["t2_w"].astype(jnp.bfloat16)
    b2 = params["t2_b"].reshape(C, 1).astype(jnp.float32)
    cent = params["centroids"].astype(jnp.float32)
    masks = build_masks(H, W, P, P_seg, nb)                                # (10, L)

    # ---- pack batch elements along the lane axis -----------------------------
    x = feature.reshape(N, C, P).astype(jnp.float32)
    if pad_n:
        x = jnp.pad(x, ((0, pad_n), (0, 0), (0, 0)))
    if P_seg != P:
        x = jnp.pad(x, ((0, 0), (0, 0), (0, P_seg - P)))
    x_packed = x.reshape(G, nb, C, P_seg).transpose(0, 2, 1, 3).reshape(G, C, L)

    kernel = functools.partial(singe_fused_kernel, NB=nb, P_seg=P_seg,
                               P_real=P, W=W)
    rep = lambda g: (0, 0)                    # replicated (weight) blocks

    out = pl.pallas_call(
        kernel,
        out_shape=jax.ShapeDtypeStruct((G, C, L), jnp.float32),
        grid=(G,),
        in_specs=[
            pl.BlockSpec((1, C, L), lambda g: (g, 0, 0)),   # packed feature
            pl.BlockSpec((10, L), rep),                     # tap / column masks
            pl.BlockSpec((C, C), rep),                      # ECA band (f32)
            pl.BlockSpec((K, 9 * C), rep),                  # 3x3 conv weights (bf16)
            pl.BlockSpec((K, 1), rep),                      # conv bias
            pl.BlockSpec((K, C), rep),                      # centroids (f32)
            pl.BlockSpec((C, K * C), rep),                  # upfc weight (bf16)
            pl.BlockSpec((C, 1), rep),                      # upfc bias
            pl.BlockSpec((C, C), rep),                      # conv1, feature half (bf16)
            pl.BlockSpec((C, C), rep),                      # conv1, up half (bf16)
            pl.BlockSpec((C, 1), rep),                      # conv1 bias
            pl.BlockSpec((C, C), rep),                      # conv2 (bf16)
            pl.BlockSpec((C, 1), rep),                      # conv2 bias
        ],
        out_specs=pl.BlockSpec((1, C, L), lambda g: (g, 0, 0)),
        scratch_shapes=[pltpu.VMEM((9 * C, L), jnp.bfloat16)],   # bf16 tap slab
        compiler_params=pltpu.CompilerParams(dimension_semantics=("parallel",)),
    )(x_packed, masks, band, w9, bconv, cent, wfc, bfc, w1f, w1u, b1, w2, b2)

    # ---- unpack lanes back to (N, C, H, W) -----------------------------------
    out = out.reshape(G, C, nb, P_seg).transpose(0, 2, 1, 3)
    out = out.reshape(G * nb, C, P_seg)[:N, :, :P].reshape(N, C, H, W)
    return out


# ----------------------------------------------------------------------------
# Parameter init (mirrors the torch module's default initialisers in spirit)
# ----------------------------------------------------------------------------
def init_params(key, C, K):
    ks = jax.random.split(key, 10)

    def u(k, shape, scale):
        return jax.random.uniform(k, shape, jnp.float32, -scale, scale)

    return {
        "eca_w": u(ks[0], (5,), 1.0 / jnp.sqrt(5.0)),
        "netup_w": u(ks[1], (K, C, 3, 3), 1.0 / jnp.sqrt(9.0 * C)),
        "netup_b": u(ks[2], (K,), 1.0 / jnp.sqrt(9.0 * C)),
        "centroids": jax.random.uniform(ks[3], (K, C), jnp.float32, 0.0, 1.0),
        "upfc_w": u(ks[4], (C, K * C), 1.0 / jnp.sqrt(1.0 * K * C)),
        "upfc_b": u(ks[5], (C,), 1.0 / jnp.sqrt(1.0 * K * C)),
        "t1_w": u(ks[6], (C, 2 * C), 1.0 / jnp.sqrt(2.0 * C)),
        "t1_b": u(ks[7], (C,), 1.0 / jnp.sqrt(2.0 * C)),
        "t2_w": u(ks[8], (C, C), 1.0 / jnp.sqrt(1.0 * C)),
        "t2_b": u(ks[9], (C,), 1.0 / jnp.sqrt(1.0 * C)),
    }


# ----------------------------------------------------------------------------
# Pure-JAX reference (torch-module structure; ECA in f32, the big contractions
# use bf16 operands with f32 accumulation like the kernel's MXU path).
# ----------------------------------------------------------------------------
def reference_forward(feature, params):
    N, C, H, W = feature.shape
    K = params["centroids"].shape[0]
    b16 = lambda t: t.astype(jnp.bfloat16)

    def eca(x4):                               # f32 banded conv (torch parity)
        pooled = jnp.mean(x4, axis=(2, 3))     # (N, C)
        pp = jnp.pad(pooled, ((0, 0), (2, 2)))
        w = params["eca_w"]
        y = sum(w[t] * pp[:, t:t + C] for t in range(5))
        return x4 * jax.nn.sigmoid(y)[:, :, None, None]

    f = eca(feature)
    xn = f * jax.lax.rsqrt(
        jnp.maximum(jnp.sum(f * f, axis=1, keepdims=True), EPS * EPS))
    xp = jnp.pad(xn, ((0, 0), (0, 0), (1, 1), (1, 1)))
    wc = params["netup_w"]
    logits = jnp.broadcast_to(params["netup_b"][None, :, None, None],
                              (N, K, H, W)).astype(jnp.float32)
    for dh in range(3):
        for dw in range(3):
            logits = logits + jnp.einsum(
                "kc,nchw->nkhw", b16(wc[:, :, dh, dw]),
                b16(xp[:, :, dh:dh + H, dw:dw + W]),
                preferred_element_type=jnp.float32)
    a = jax.nn.softmax(logits, axis=1).reshape(N, K, H * W)
    xf = xn.reshape(N, C, H * W)
    up1 = jnp.einsum("nkp,ncp->nkc", b16(a), b16(xf),
                     preferred_element_type=jnp.float32)
    asum = jnp.sum(a, axis=2)
    up = up1 - asum[:, :, None] * params["centroids"][None]
    up = up * jax.lax.rsqrt(
        jnp.maximum(jnp.sum(up * up, axis=2, keepdims=True), EPS * EPS))
    upf = up.reshape(N, K * C)
    upf = upf * jax.lax.rsqrt(
        jnp.maximum(jnp.sum(upf * upf, axis=1, keepdims=True), EPS * EPS))
    y = jnp.einsum("ni,oi->no", b16(upf), b16(params["upfc_w"]),
                   preferred_element_type=jnp.float32) + params["upfc_b"]
    up_map = jnp.broadcast_to(y[:, :, None, None], (N, C, H, W))
    up_e = eca(up_map)
    cat = jnp.concatenate([f, up_e], axis=1)
    h = jnp.einsum("oi,nihw->nohw", b16(params["t1_w"]), b16(cat),
                   preferred_element_type=jnp.float32) \
        + params["t1_b"][None, :, None, None]
    h = jnp.maximum(h, 0.0)
    o = jnp.einsum("oi,nihw->nohw", b16(params["t2_w"]), b16(h),
                   preferred_element_type=jnp.float32) \
        + params["t2_b"][None, :, None, None]
    return jnp.maximum(o, 0.0)


if __name__ == "__main__":
    N, C, H, W = 2, 32, 8, 8      # in_c = 32
    K = 8                         # num_p = 8

    key = jax.random.PRNGKey(0)
    k_feat, k_par = jax.random.split(key)
    feature = jax.random.normal(k_feat, (N, C, H, W), jnp.float32)
    params = init_params(k_par, C, K)

    ref = reference_forward(feature, params)

    # default: batch elements packed along lanes (here NB=2 -> one 128-lane step)
    out = jax.block_until_ready(jax.jit(singe_prototype_forward)(feature, params))
    assert out.shape == (N, C, H, W)
    err = float(jnp.max(jnp.abs(out - ref)))
    assert err < 5e-3, f"packed path: max abs diff vs reference: {err}"

    # also exercise the unpacked path (1 element / grid step, lane-padded to
    # 128): >=2 "parallel" grid steps so both v7x TensorCores get work.
    out1 = jax.block_until_ready(
        jax.jit(functools.partial(singe_prototype_forward, nb=1))(feature, params))
    err1 = float(jnp.max(jnp.abs(out1 - ref)))
    assert err1 < 5e-3, f"unpacked path: max abs diff vs reference: {err1}"

    print("KERNEL_OK")
</pallas_src>

<mosaic_0001>
module attributes {stable_mosaic.version = 11 : i64} {
  func.func @singe_fused_kernel(%arg0: i32, %arg1: memref<1x32x128xf32, #tpu.memory_space<vmem>>, %arg2: memref<10x128xf32, #tpu.memory_space<vmem>>, %arg3: memref<32x32xf32, #tpu.memory_space<vmem>>, %arg4: memref<8x288xbf16, #tpu.memory_space<vmem>>, %arg5: memref<8x1xf32, #tpu.memory_space<vmem>>, %arg6: memref<8x32xf32, #tpu.memory_space<vmem>>, %arg7: memref<32x256xbf16, #tpu.memory_space<vmem>>, %arg8: memref<32x1xf32, #tpu.memory_space<vmem>>, %arg9: memref<32x32xbf16, #tpu.memory_space<vmem>>, %arg10: memref<32x32xbf16, #tpu.memory_space<vmem>>, %arg11: memref<32x1xf32, #tpu.memory_space<vmem>>, %arg12: memref<32x32xbf16, #tpu.memory_space<vmem>>, %arg13: memref<32x1xf32, #tpu.memory_space<vmem>>, %arg14: memref<1x32x128xf32, #tpu.memory_space<vmem>>, %arg15: memref<288x128xbf16, #tpu.memory_space<vmem>>) attributes {dimension_semantics = [#tpu.dimension_semantics<parallel>], iteration_bounds = array<i64: 1>, scalar_prefetch = 0 : i64, scratch_operands = 1 : i64, tpu.core_type = #tpu.core_type<tc>, window_params = [{transform_indices = @transform_0, window_bounds = array<i64: 1, 32, 128>}, {pipeline_mode = #tpu.pipeline_mode<synchronous>, transform_indices = @transform_1, window_bounds = array<i64: 10, 128>}, {pipeline_mode = #tpu.pipeline_mode<synchronous>, transform_indices = @transform_2, window_bounds = array<i64: 32, 32>}, {pipeline_mode = #tpu.pipeline_mode<synchronous>, transform_indices = @transform_3, window_bounds = array<i64: 8, 288>}, {pipeline_mode = #tpu.pipeline_mode<synchronous>, transform_indices = @transform_4, window_bounds = array<i64: 8, 1>}, {pipeline_mode = #tpu.pipeline_mode<synchronous>, transform_indices = @transform_5, window_bounds = array<i64: 8, 32>}, {pipeline_mode = #tpu.pipeline_mode<synchronous>, transform_indices = @transform_6, window_bounds = array<i64: 32, 256>}, {pipeline_mode = #tpu.pipeline_mode<synchronous>, transform_indices = @transform_7, window_bounds = array<i64: 32, 1>}, {pipeline_mode = #tpu.pipeline_mode<synchronous>, transform_indices = @transform_8, window_bounds = array<i64: 32, 32>}, {pipeline_mode = #tpu.pipeline_mode<synchronous>, transform_indices = @transform_9, window_bounds = array<i64: 32, 32>}, {pipeline_mode = #tpu.pipeline_mode<synchronous>, transform_indices = @transform_10, window_bounds = array<i64: 32, 1>}, {pipeline_mode = #tpu.pipeline_mode<synchronous>, transform_indices = @transform_11, window_bounds = array<i64: 32, 32>}, {pipeline_mode = #tpu.pipeline_mode<synchronous>, transform_indices = @transform_12, window_bounds = array<i64: 32, 1>}, {transform_indices = @transform_13, window_bounds = array<i64: 1, 32, 128>}]} {
    %c0 = arith.constant 0 : index
    %c0_0 = arith.constant 0 : index
    %c0_1 = arith.constant 0 : index
    %0 = vector.load %arg1[%c0, %c0_0, %c0_1] : memref<1x32x128xf32, #tpu.memory_space<vmem>>, vector<1x32x128xf32>
    %1 = vector.shape_cast %0 : vector<1x32x128xf32> to vector<32x128xf32>
    %2 = vector.extract_strided_slice %1 {offsets = [0, 0], sizes = [32, 64], strides = [1, 1]} : vector<32x128xf32> to vector<32x64xf32>
    %cst = arith.constant dense<0.000000e+00> : vector<32xf32>
    %3 = vector.multi_reduction <add>, %2, %cst [1] : vector<32x64xf32> to vector<32xf32>
    %4 = vector.shape_cast %3 : vector<32xf32> to vector<32x1xf32>
    %5 = vector.extract_strided_slice %1 {offsets = [0, 64], sizes = [32, 64], strides = [1, 1]} : vector<32x128xf32> to vector<32x64xf32>
    %cst_2 = arith.constant dense<0.000000e+00> : vector<32xf32>
    %6 = vector.multi_reduction <add>, %5, %cst_2 [1] : vector<32x64xf32> to vector<32xf32>
    %7 = vector.shape_cast %6 : vector<32xf32> to vector<32x1xf32>
    %8 = tpu.concatenate %4, %7 in 1 : vector<32x1xf32>, vector<32x1xf32> -> vector<32x2xf32>
    %cst_3 = arith.constant 1.562500e-02 : f32
    %9 = vector.broadcast %cst_3 : f32 to vector<32x2xf32>
    %10 = arith.mulf %8, %9 : vector<32x2xf32>
    %c0_4 = arith.constant 0 : index
    %c0_5 = arith.constant 0 : index
    %11 = vector.load %arg3[%c0_4, %c0_5] : memref<32x32xf32, #tpu.memory_space<vmem>>, vector<32x32xf32>
    %cst_6 = arith.constant dense<0.000000e+00> : vector<32x2xf32>
    %12 = tpu.matmul %11, %10, %cst_6 {dimension_numbers = #tpu.dot_dimension_numbers<[1], [0], [0], [1], [0, 0, 1, 1], [], []>} : vector<32x32xf32>, vector<32x2xf32>, vector<32x2xf32> -> vector<32x2xf32>
    %13 = arith.negf %12 : vector<32x2xf32>
    %14 = math.exp %13 : vector<32x2xf32>
    %cst_7 = arith.constant 1.000000e+00 : f32
    %15 = vector.broadcast %cst_7 : f32 to vector<32x2xf32>
    %16 = arith.addf %15, %14 : vector<32x2xf32>
    %17 = arith.divf %15, %16 : vector<32x2xf32>
    %18 = vector.extract_strided_slice %17 {offsets = [0, 0], sizes = [32, 1], strides = [1, 1]} : vector<32x2xf32> to vector<32x1xf32>
    %19 = vector.shape_cast %18 : vector<32x1xf32> to vector<32x1xf32>
    %20 = vector.broadcast %19 : vector<32x1xf32> to vector<32x64xf32>
    %21 = vector.extract_strided_slice %17 {offsets = [0, 1], sizes = [32, 1], strides = [1, 1]} : vector<32x2xf32> to vector<32x1xf32>
    %22 = vector.shape_cast %21 : vector<32x1xf32> to vector<32x1xf32>
    %23 = vector.broadcast %22 : vector<32x1xf32> to vector<32x64xf32>
    %24 = tpu.concatenate %20, %23 in 1 : vector<32x64xf32>, vector<32x64xf32> -> vector<32x128xf32>
    %25 = arith.mulf %1, %24 : vector<32x128xf32>
    %26 = arith.mulf %25, %25 : vector<32x128xf32>
    %cst_8 = arith.constant dense<0.000000e+00> : vector<128xf32>
    %27 = vector.multi_reduction <add>, %26, %cst_8 [0] : vector<32x128xf32> to vector<128xf32>
    %28 = vector.shape_cast %27 : vector<128xf32> to vector<1x128xf32>
    %cst_9 = arith.constant 1.000000e-24 : f32
    %29 = vector.broadcast %cst_9 : f32 to vector<1x128xf32>
    %30 = arith.maximumf %28, %29 : vector<1x128xf32>
    %31 = math.rsqrt %30 : vector<1x128xf32>
    %32 = vector.broadcast %31 : vector<1x128xf32> to vector<32x128xf32>
    %33 = arith.mulf %25, %32 : vector<32x128xf32>
    %c9_i32 = arith.constant 9 : i32
    %34 = tpu.dynamic_rotate %33 by %c9_i32 dim 1 : vector<32x128xf32>, i32 -> vector<32x128xf32>
    %c0_10 = arith.constant 0 : index
    %c0_11 = arith.constant 0 : index
    %35 = vector.load %arg2[%c0_10, %c0_11] : memref<10x128xf32, #tpu.memory_space<vmem>>, vector<1x128xf32>
    %36 = vector.broadcast %35 : vector<1x128xf32> to vector<32x128xf32>
    %37 = arith.mulf %34, %36 : vector<32x128xf32>
    %38 = arith.truncf %37 : vector<32x128xf32> to vector<32x128xbf16>
    %c0_12 = arith.constant 0 : index
    %c0_13 = arith.constant 0 : index
    %39 = vector.load %arg15[%c0_12, %c0_13] : memref<288x128xbf16, #tpu.memory_space<vmem>>, vector<32x128xbf16>
    tpu.vector_store %arg15[%c0_12, %c0_13], %38 {strides = array<i32>} : memref<288x128xbf16, #tpu.memory_space<vmem>>, vector<32x128xbf16>,
    %c8_i32 = arith.constant 8 : i32
    %40 = tpu.dynamic_rotate %33 by %c8_i32 dim 1 : vector<32x128xf32>, i32 -> vector<32x128xf32>
    %c1 = arith.constant 1 : index
    %c0_14 = arith.constant 0 : index
    %41 = vector.load %arg2[%c1, %c0_14] : memref<10x128xf32, #tpu.memory_space<vmem>>, vector<1x128xf32>
    %42 = vector.broadcast %41 : vector<1x128xf32> to vector<32x128xf32>
    %43 = arith.mulf %40, %42 : vector<32x128xf32>
    %44 = arith.truncf %43 : vector<32x128xf32> to vector<32x128xbf16>
    %c32 = arith.constant 32 : index
    %c0_15 = arith.constant 0 : index
    %45 = vector.load %arg15[%c32, %c0_15] : memref<288x128xbf16, #tpu.memory_space<vmem>>, vector<32x128xbf16>
    tpu.vector_store %arg15[%c32, %c0_15], %44 {strides = array<i32>} : memref<288x128xbf16, #tpu.memory_space<vmem>>, vector<32x128xbf16>,
    %c7_i32 = arith.constant 7 : i32
    %46 = tpu.dynamic_rotate %33 by %c7_i32 dim 1 : vector<32x128xf32>, i32 -> vector<32x128xf32>
    %c2 = arith.constant 2 : index
    %c0_16 = arith.constant 0 : index
    %47 = vector.load %arg2[%c2, %c0_16] : memref<10x128xf32, #tpu.memory_space<vmem>>, vector<1x128xf32>
    %48 = vector.broadcast %47 : vector<1x128xf32> to vector<32x128xf32>
    %49 = arith.mulf %46, %48 : vector<32x128xf32>
    %50 = arith.truncf %49 : vector<32x128xf32> to vector<32x128xbf16>
    %c64 = arith.constant 64 : index
    %c0_17 = arith.constant 0 : index
    %51 = vector.load %arg15[%c64, %c0_17] : memref<288x128xbf16, #tpu.memory_space<vmem>>, vector<32x128xbf16>
    tpu.vector_store %arg15[%c64, %c0_17], %50 {strides = array<i32>} : memref<288x128xbf16, #tpu.memory_space<vmem>>, vector<32x128xbf16>,
    %c1_i32 = arith.constant 1 : i32
    %52 = tpu.dynamic_rotate %33 by %c1_i32 dim 1 : vector<32x128xf32>, i32 -> vector<32x128xf32>
    %c3 = arith.constant 3 : index
    %c0_18 = arith.constant 0 : index
    %53 = vector.load %arg2[%c3, %c0_18] : memref<10x128xf32, #tpu.memory_space<vmem>>, vector<1x128xf32>
    %54 = vector.broadcast %53 : vector<1x128xf32> to vector<32x128xf32>
    %55 = arith.mulf %52, %54 : vector<32x128xf32>
    %56 = arith.truncf %55 : vector<32x128xf32> to vector<32x128xbf16>
    %c96 = arith.constant 96 : index
    %c0_19 = arith.constant 0 : index
    %57 = vector.load %arg15[%c96, %c0_19] : memref<288x128xbf16, #tpu.memory_space<vmem>>, vector<32x128xbf16>
    tpu.vector_store %arg15[%c96, %c0_19], %56 {strides = array<i32>} : memref<288x128xbf16, #tpu.memory_space<vmem>>, vector<32x128xbf16>,
    %c4 = arith.constant 4 : index
    %c0_20 = arith.constant 0 : index
    %58 = vector.load %arg2[%c4, %c0_20] : memref<10x128xf32, #tpu.memory_space<vmem>>, vector<1x128xf32>
    %59 = vector.broadcast %58 : vector<1x128xf32> to vector<32x128xf32>
    %60 = arith.mulf %33, %59 : vector<32x128xf32>
    %61 = arith.truncf %60 : vector<32x128xf32> to vector<32x128xbf16>
    %c128 = arith.constant 128 : index
    %c0_21 = arith.constant 0 : index
    %62 = vector.load %arg15[%c128, %c0_21] : memref<288x128xbf16, #tpu.memory_space<vmem>>, vector<32x128xbf16>
    tpu.vector_store %arg15[%c128, %c0_21], %61 {strides = array<i32>} : memref<288x128xbf16, #tpu.memory_space<vmem>>, vector<32x128xbf16>,
    %c127_i32 = arith.constant 127 : i32
    %63 = tpu.dynamic_rotate %33 by %c127_i32 dim 1 : vector<32x128xf32>, i32 -> vector<32x128xf32>
    %c5 = arith.constant 5 : index
    %c0_22 = arith.constant 0 : index
    %64 = vector.load %arg2[%c5, %c0_22] : memref<10x128xf32, #tpu.memory_space<vmem>>, vector<1x128xf32>
    %65 = vector.broadcast %64 : vector<1x128xf32> to vector<32x128xf32>
    %66 = arith.mulf %63, %65 : vector<32x128xf32>
    %67 = arith.truncf %66 : vector<32x128xf32> to vector<32x128xbf16>
    %c160 = arith.constant 160 : index
    %c0_23 = arith.constant 0 : index
    %68 = vector.load %arg15[%c160, %c0_23] : memref<288x128xbf16, #tpu.memory_space<vmem>>, vector<32x128xbf16>
    tpu.vector_store %arg15[%c160, %c0_23], %67 {strides = array<i32>} : memref<288x128xbf16, #tpu.memory_space<vmem>>, vector<32x128xbf16>,
    %c121_i32 = arith.constant 121 : i32
    %69 = tpu.dynamic_rotate %33 by %c121_i32 dim 1 : vector<32x128xf32>, i32 -> vector<32x128xf32>
    %c6 = arith.constant 6 : index
    %c0_24 = arith.constant 0 : index
    %70 = vector.load %arg2[%c6, %c0_24] : memref<10x128xf32, #tpu.memory_space<vmem>>, vector<1x128xf32>
    %71 = vector.broadcast %70 : vector<1x128xf32> to vector<32x128xf32>
    %72 = arith.mulf %69, %71 : vector<32x128xf32>
    %73 = arith.truncf %72 : vector<32x128xf32> to vector<32x128xbf16>
    %c192 = arith.constant 192 : index
    %c0_25 = arith.constant 0 : index
    %74 = vector.load %arg15[%c192, %c0_25] : memref<288x128xbf16, #tpu.memory_space<vmem>>, vector<32x128xbf16>
    tpu.vector_store %arg15[%c192, %c0_25], %73 {strides = array<i32>} : memref<288x128xbf16, #tpu.memory_space<vmem>>, vector<32x128xbf16>,
    %c120_i32 = arith.constant 120 : i32
    %75 = tpu.dynamic_rotate %33 by %c120_i32 dim 1 : vector<32x128xf32>, i32 -> vector<32x128xf32>
    %c7 = arith.constant 7 : index
    %c0_26 = arith.constant 0 : index
    %76 = vector.load %arg2[%c7, %c0_26] : memref<10x128xf32, #tpu.memory_space<vmem>>, vector<1x128xf32>
    %77 = vector.broadcast %76 : vector<1x128xf32> to vector<32x128xf32>
    %78 = arith.mulf %75, %77 : vector<32x128xf32>
    %79 = arith.truncf %78 : vector<32x128xf32> to vector<32x128xbf16>
    %c224 = arith.constant 224 : index
    %c0_27 = arith.constant 0 : index
    %80 = vector.load %arg15[%c224, %c0_27] : memref<288x128xbf16, #tpu.memory_space<vmem>>, vector<32x128xbf16>
    tpu.vector_store %arg15[%c224, %c0_27], %79 {strides = array<i32>} : memref<288x128xbf16, #tpu.memory_space<vmem>>, vector<32x128xbf16>,
    %c119_i32 = arith.constant 119 : i32
    %81 = tpu.dynamic_rotate %33 by %c119_i32 dim 1 : vector<32x128xf32>, i32 -> vector<32x128xf32>
    %c8 = arith.constant 8 : index
    %c0_28 = arith.constant 0 : index
    %82 = vector.load %arg2[%c8, %c0_28] : memref<10x128xf32, #tpu.memory_space<vmem>>, vector<1x128xf32>
    %83 = vector.broadcast %82 : vector<1x128xf32> to vector<32x128xf32>
    %84 = arith.mulf %81, %83 : vector<32x128xf32>
    %85 = arith.truncf %84 : vector<32x128xf32> to vector<32x128xbf16>
    %c256 = arith.constant 256 : index
    %c0_29 = arith.constant 0 : index
    %86 = vector.load %arg15[%c256, %c0_29] : memref<288x128xbf16, #tpu.memory_space<vmem>>, vector<32x128xbf16>
    tpu.vector_store %arg15[%c256, %c0_29], %85 {strides = array<i32>} : memref<288x128xbf16, #tpu.memory_space<vmem>>, vector<32x128xbf16>,
    %c0_30 = arith.constant 0 : index
    %c0_31 = arith.constant 0 : index
    %87 = vector.load %arg4[%c0_30, %c0_31] : memref<8x288xbf16, #tpu.memory_space<vmem>>, vector<8x288xbf16>
    %c0_32 = arith.constant 0 : index
    %c0_33 = arith.constant 0 : index
    %88 = vector.load %arg15[%c0_32, %c0_33] : memref<288x128xbf16, #tpu.memory_space<vmem>>, vector<288x128xbf16>
    %cst_34 = arith.constant dense<0.000000e+00> : vector<8x128xf32>
    %89 = tpu.matmul %87, %88, %cst_34 {dimension_numbers = #tpu.dot_dimension_numbers<[1], [0], [0], [1], [0, 0, 1, 1], [], []>} : vector<8x288xbf16>, vector<288x128xbf16>, vector<8x128xf32> -> vector<8x128xf32>
    %c0_35 = arith.constant 0 : index
    %c0_36 = arith.constant 0 : index
    %90 = vector.load %arg5[%c0_35, %c0_36] : memref<8x1xf32, #tpu.memory_space<vmem>>, vector<8x1xf32>
    %91 = vector.broadcast %90 : vector<8x1xf32> to vector<8x128xf32>
    %92 = arith.addf %89, %91 : vector<8x128xf32>
    %cst_37 = arith.constant dense<0xFF800000> : vector<128xf32>
    %93 = vector.multi_reduction <maximumf>, %92, %cst_37 [0] : vector<8x128xf32> to vector<128xf32>
    %94 = vector.shape_cast %93 : vector<128xf32> to vector<1x128xf32>
    %95 = vector.broadcast %94 : vector<1x128xf32> to vector<8x128xf32>
    %96 = arith.subf %92, %95 : vector<8x128xf32>
    %97 = math.exp %96 : vector<8x128xf32>
    %cst_38 = arith.constant dense<0.000000e+00> : vector<128xf32>
    %98 = vector.multi_reduction <add>, %97, %cst_38 [0] : vector<8x128xf32> to vector<128xf32>
    %99 = vector.shape_cast %98 : vector<128xf32> to vector<1x128xf32>
    %100 = tpu.reciprocal %99 {approx = true} : vector<1x128xf32> -> vector<1x128xf32>
    %101 = vector.broadcast %100 : vector<1x128xf32> to vector<8x128xf32>
    %102 = arith.mulf %97, %101 : vector<8x128xf32>
    %c9 = arith.constant 9 : index
    %c0_39 = arith.constant 0 : index
    %103 = vector.load %arg2[%c9, %c0_39] : memref<10x128xf32, #tpu.memory_space<vmem>>, vector<1x128xf32>
    %104 = vector.broadcast %103 : vector<1x128xf32> to vector<8x128xf32>
    %105 = arith.mulf %102, %104 : vector<8x128xf32>
    %106 = arith.truncf %105 : vector<8x128xf32> to vector<8x128xbf16>
    %107 = arith.truncf %33 : vector<32x128xf32> to vector<32x128xbf16>
    %c0_40 = arith.constant 0 : index
    %c0_41 = arith.constant 0 : index
    %108 = vector.load %arg6[%c0_40, %c0_41] : memref<8x32xf32, #tpu.memory_space<vmem>>, vector<8x32xf32>
    %109 = vector.extract_strided_slice %106 {offsets = [0, 0], sizes = [8, 64], strides = [1, 1]} : vector<8x128xbf16> to vector<8x64xbf16>
    %110 = vector.extract_strided_slice %107 {offsets = [0, 0], sizes = [32, 64], strides = [1, 1]} : vector<32x128xbf16> to vector<32x64xbf16>
    %cst_42 = arith.constant dense<0.000000e+00> : vector<8x32xf32>
    %111 = tpu.matmul %109, %110, %cst_42 {dimension_numbers = #tpu.dot_dimension_numbers<[1], [1], [0], [0], [0, 0, 1, 0], [], []>} : vector<8x64xbf16>, vector<32x64xbf16>, vector<8x32xf32> -> vector<8x32xf32>
    %112 = vector.extract_strided_slice %105 {offsets = [0, 0], sizes = [8, 64], strides = [1, 1]} : vector<8x128xf32> to vector<8x64xf32>
    %cst_43 = arith.constant dense<0.000000e+00> : vector<8xf32>
    %113 = vector.multi_reduction <add>, %112, %cst_43 [1] : vector<8x64xf32> to vector<8xf32>
    %114 = vector.shape_cast %113 : vector<8xf32> to vector<8x1xf32>
    %115 = vector.broadcast %114 : vector<8x1xf32> to vector<8x32xf32>
    %116 = arith.mulf %115, %108 : vector<8x32xf32>
    %117 = arith.subf %111, %116 : vector<8x32xf32>
    %118 = arith.mulf %117, %117 : vector<8x32xf32>
    %cst_44 = arith.constant dense<0.000000e+00> : vector<8xf32>
    %119 = vector.multi_reduction <add>, %118, %cst_44 [1] : vector<8x32xf32> to vector<8xf32>
    %120 = vector.shape_cast %119 : vector<8xf32> to vector<8x1xf32>
    %cst_45 = arith.constant 1.000000e-24 : f32
    %121 = vector.broadcast %cst_45 : f32 to vector<8x1xf32>
    %122 = arith.maximumf %120, %121 : vector<8x1xf32>
    %123 = math.rsqrt %122 : vector<8x1xf32>
    %124 = vector.broadcast %123 : vector<8x1xf32> to vector<8x32xf32>
    %125 = arith.mulf %117, %124 : vector<8x32xf32>
    %126 = arith.mulf %125, %125 : vector<8x32xf32>
    %cst_46 = arith.constant dense<0.000000e+00> : vector<8xf32>
    %127 = vector.multi_reduction <add>, %126, %cst_46 [1] : vector<8x32xf32> to vector<8xf32>
    %128 = vector.shape_cast %127 : vector<8xf32> to vector<8x1xf32>
    %cst_47 = arith.constant dense<0.000000e+00> : vector<1xf32>
    %129 = vector.multi_reduction <add>, %128, %cst_47 [0] : vector<8x1xf32> to vector<1xf32>
    %130 = vector.shape_cast %129 : vector<1xf32> to vector<1x1xf32>
    %cst_48 = arith.constant 1.000000e-24 : f32
    %131 = vector.broadcast %cst_48 : f32 to vector<1x1xf32>
    %132 = arith.maximumf %130, %131 : vector<1x1xf32>
    %133 = math.rsqrt %132 : vector<1x1xf32>
    %134 = vector.broadcast %133 : vector<1x1xf32> to vector<8x32xf32>
    %135 = arith.mulf %125, %134 : vector<8x32xf32>
    %136 = vector.extract_strided_slice %135 {offsets = [0, 0], sizes = [1, 32], strides = [1, 1]} : vector<8x32xf32> to vector<1x32xf32>
    %137 = vector.extract_strided_slice %135 {offsets = [1, 0], sizes = [1, 32], strides = [1, 1]} : vector<8x32xf32> to vector<1x32xf32>
    %138 = vector.extract_strided_slice %135 {offsets = [2, 0], sizes = [1, 32], strides = [1, 1]} : vector<8x32xf32> to vector<1x32xf32>
    %139 = vector.extract_strided_slice %135 {offsets = [3, 0], sizes = [1, 32], strides = [1, 1]} : vector<8x32xf32> to vector<1x32xf32>
    %140 = vector.extract_strided_slice %135 {offsets = [4, 0], sizes = [1, 32], strides = [1, 1]} : vector<8x32xf32> to vector<1x32xf32>
    %141 = vector.extract_strided_slice %135 {offsets = [5, 0], sizes = [1, 32], strides = [1, 1]} : vector<8x32xf32> to vector<1x32xf32>
    %142 = vector.extract_strided_slice %135 {offsets = [6, 0], sizes = [1, 32], strides = [1, 1]} : vector<8x32xf32> to vector<1x32xf32>
    %143 = vector.extract_strided_slice %135 {offsets = [7, 0], sizes = [1, 32], strides = [1, 1]} : vector<8x32xf32> to vector<1x32xf32>
    %144 = tpu.concatenate %136, %137, %138, %139, %140, %141, %142, %143 in 1 : vector<1x32xf32>, vector<1x32xf32>, vector<1x32xf32>, vector<1x32xf32>, vector<1x32xf32>, vector<1x32xf32>, vector<1x32xf32>, vector<1x32xf32> -> vector<1x256xf32>
    %145 = vector.extract_strided_slice %106 {offsets = [0, 64], sizes = [8, 64], strides = [1, 1]} : vector<8x128xbf16> to vector<8x64xbf16>
    %146 = vector.extract_strided_slice %107 {offsets = [0, 64], sizes = [32, 64], strides = [1, 1]} : vector<32x128xbf16> to vector<32x64xbf16>
    %cst_49 = arith.constant dense<0.000000e+00> : vector<8x32xf32>
    %147 = tpu.matmul %145, %146, %cst_49 {dimension_numbers = #tpu.dot_dimension_numbers<[1], [1], [0], [0], [0, 0, 1, 0], [], []>} : vector<8x64xbf16>, vector<32x64xbf16>, vector<8x32xf32> -> vector<8x32xf32>
    %148 = vector.extract_strided_slice %105 {offsets = [0, 64], sizes = [8, 64], strides = [1, 1]} : vector<8x128xf32> to vector<8x64xf32>
    %cst_50 = arith.constant dense<0.000000e+00> : vector<8xf32>
    %149 = vector.multi_reduction <add>, %148, %cst_50 [1] : vector<8x64xf32> to vector<8xf32>
    %150 = vector.shape_cast %149 : vector<8xf32> to vector<8x1xf32>
    %151 = vector.broadcast %150 : vector<8x1xf32> to vector<8x32xf32>
    %152 = arith.mulf %151, %108 : vector<8x32xf32>
    %153 = arith.subf %147, %152 : vector<8x32xf32>
    %154 = arith.mulf %153, %153 : vector<8x32xf32>
    %cst_51 = arith.constant dense<0.000000e+00> : vector<8xf32>
    %155 = vector.multi_reduction <add>, %154, %cst_51 [1] : vector<8x32xf32> to vector<8xf32>
    %156 = vector.shape_cast %155 : vector<8xf32> to vector<8x1xf32>
    %cst_52 = arith.constant 1.000000e-24 : f32
    %157 = vector.broadcast %cst_52 : f32 to vector<8x1xf32>
    %158 = arith.maximumf %156, %157 : vector<8x1xf32>
    %159 = math.rsqrt %158 : vector<8x1xf32>
    %160 = vector.broadcast %159 : vector<8x1xf32> to vector<8x32xf32>
    %161 = arith.mulf %153, %160 : vector<8x32xf32>
    %162 = arith.mulf %161, %161 : vector<8x32xf32>
    %cst_53 = arith.constant dense<0.000000e+00> : vector<8xf32>
    %163 = vector.multi_reduction <add>, %162, %cst_53 [1] : vector<8x32xf32> to vector<8xf32>
    %164 = vector.shape_cast %163 : vector<8xf32> to vector<8x1xf32>
    %cst_54 = arith.constant dense<0.000000e+00> : vector<1xf32>
    %165 = vector.multi_reduction <add>, %164, %cst_54 [0] : vector<8x1xf32> to vector<1xf32>
    %166 = vector.shape_cast %165 : vector<1xf32> to vector<1x1xf32>
    %cst_55 = arith.constant 1.000000e-24 : f32
    %167 = vector.broadcast %cst_55 : f32 to vector<1x1xf32>
    %168 = arith.maximumf %166, %167 : vector<1x1xf32>
    %169 = math.rsqrt %168 : vector<1x1xf32>
    %170 = vector.broadcast %169 : vector<1x1xf32> to vector<8x32xf32>
    %171 = arith.mulf %161, %170 : vector<8x32xf32>
    %172 = vector.extract_strided_slice %171 {offsets = [0, 0], sizes = [1, 32], strides = [1, 1]} : vector<8x32xf32> to vector<1x32xf32>
    %173 = vector.extract_strided_slice %171 {offsets = [1, 0], sizes = [1, 32], strides = [1, 1]} : vector<8x32xf32> to vector<1x32xf32>
    %174 = vector.extract_strided_slice %171 {offsets = [2, 0], sizes = [1, 32], strides = [1, 1]} : vector<8x32xf32> to vector<1x32xf32>
    %175 = vector.extract_strided_slice %171 {offsets = [3, 0], sizes = [1, 32], strides = [1, 1]} : vector<8x32xf32> to vector<1x32xf32>
    %176 = vector.extract_strided_slice %171 {offsets = [4, 0], sizes = [1, 32], strides = [1, 1]} : vector<8x32xf32> to vector<1x32xf32>
    %177 = vector.extract_strided_slice %171 {offsets = [5, 0], sizes = [1, 32], strides = [1, 1]} : vector<8x32xf32> to vector<1x32xf32>
    %178 = vector.extract_strided_slice %171 {offsets = [6, 0], sizes = [1, 32], strides = [1, 1]} : vector<8x32xf32> to vector<1x32xf32>
    %179 = vector.extract_strided_slice %171 {offsets = [7, 0], sizes = [1, 32], strides = [1, 1]} : vector<8x32xf32> to vector<1x32xf32>
    %180 = tpu.concatenate %172, %173, %174, %175, %176, %177, %178, %179 in 1 : vector<1x32xf32>, vector<1x32xf32>, vector<1x32xf32>, vector<1x32xf32>, vector<1x32xf32>, vector<1x32xf32>, vector<1x32xf32>, vector<1x32xf32> -> vector<1x256xf32>
    %181 = tpu.concatenate %144, %180 in 0 : vector<1x256xf32>, vector<1x256xf32> -> vector<2x256xf32>
    %182 = arith.truncf %181 : vector<2x256xf32> to vector<2x256xbf16>
    %c0_56 = arith.constant 0 : index
    %c0_57 = arith.constant 0 : index
    %183 = vector.load %arg7[%c0_56, %c0_57] : memref<32x256xbf16, #tpu.memory_space<vmem>>, vector<32x256xbf16>
    %cst_58 = arith.constant dense<0.000000e+00> : vector<32x2xf32>
    %184 = tpu.matmul %183, %182, %cst_58 {dimension_numbers = #tpu.dot_dimension_numbers<[1], [1], [0], [0], [0, 0, 1, 0], [], []>} : vector<32x256xbf16>, vector<2x256xbf16>, vector<32x2xf32> -> vector<32x2xf32>
    %c0_59 = arith.constant 0 : index
    %c0_60 = arith.constant 0 : index
    %185 = vector.load %arg8[%c0_59, %c0_60] : memref<32x1xf32, #tpu.memory_space<vmem>>, vector<32x1xf32>
    %186 = vector.broadcast %185 : vector<32x1xf32> to vector<32x2xf32>
    %187 = arith.addf %184, %186 : vector<32x2xf32>
    %c0_61 = arith.constant 0 : index
    %c0_62 = arith.constant 0 : index
    %188 = vector.load %arg3[%c0_61, %c0_62] : memref<32x32xf32, #tpu.memory_space<vmem>>, vector<32x32xf32>
    %cst_63 = arith.constant dense<0.000000e+00> : vector<32x2xf32>
    %189 = tpu.matmul %188, %187, %cst_63 {dimension_numbers = #tpu.dot_dimension_numbers<[1], [0], [0], [1], [0, 0, 1, 1], [], []>} : vector<32x32xf32>, vector<32x2xf32>, vector<32x2xf32> -> vector<32x2xf32>
    %190 = arith.negf %189 : vector<32x2xf32>
    %191 = math.exp %190 : vector<32x2xf32>
    %cst_64 = arith.constant 1.000000e+00 : f32
    %192 = vector.broadcast %cst_64 : f32 to vector<32x2xf32>
    %193 = arith.addf %192, %191 : vector<32x2xf32>
    %194 = arith.divf %192, %193 : vector<32x2xf32>
    %195 = arith.mulf %187, %194 : vector<32x2xf32>
    %c0_65 = arith.constant 0 : index
    %c0_66 = arith.constant 0 : index
    %196 = vector.load %arg10[%c0_65, %c0_66] : memref<32x32xbf16, #tpu.memory_space<vmem>>, vector<32x32xbf16>
    %197 = arith.truncf %195 : vector<32x2xf32> to vector<32x2xbf16>
    %cst_67 = arith.constant dense<0.000000e+00> : vector<32x2xf32>
    %198 = tpu.matmul %196, %197, %cst_67 {dimension_numbers = #tpu.dot_dimension_numbers<[1], [0], [0], [1], [0, 0, 1, 1], [], []>} : vector<32x32xbf16>, vector<32x2xbf16>, vector<32x2xf32> -> vector<32x2xf32>
    %199 = vector.extract_strided_slice %198 {offsets = [0, 0], sizes = [32, 1], strides = [1, 1]} : vector<32x2xf32> to vector<32x1xf32>
    %200 = vector.shape_cast %199 : vector<32x1xf32> to vector<32x1xf32>
    %201 = vector.broadcast %200 : vector<32x1xf32> to vector<32x64xf32>
    %202 = vector.extract_strided_slice %198 {offsets = [0, 1], sizes = [32, 1], strides = [1, 1]} : vector<32x2xf32> to vector<32x1xf32>
    %203 = vector.shape_cast %202 : vector<32x1xf32> to vector<32x1xf32>
    %204 = vector.broadcast %203 : vector<32x1xf32> to vector<32x64xf32>
    %205 = tpu.concatenate %201, %204 in 1 : vector<32x64xf32>, vector<32x64xf32> -> vector<32x128xf32>
    %c0_68 = arith.constant 0 : index
    %c0_69 = arith.constant 0 : index
    %206 = vector.load %arg9[%c0_68, %c0_69] : memref<32x32xbf16, #tpu.memory_space<vmem>>, vector<32x32xbf16>
    %207 = arith.truncf %25 : vector<32x128xf32> to vector<32x128xbf16>
    %cst_70 = arith.constant dense<0.000000e+00> : vector<32x128xf32>
    %208 = tpu.matmul %206, %207, %cst_70 {dimension_numbers = #tpu.dot_dimension_numbers<[1], [0], [0], [1], [0, 0, 1, 1], [], []>} : vector<32x32xbf16>, vector<32x128xbf16>, vector<32x128xf32> -> vector<32x128xf32>
    %209 = arith.addf %208, %205 : vector<32x128xf32>
    %c0_71 = arith.constant 0 : index
    %c0_72 = arith.constant 0 : index
    %210 = vector.load %arg11[%c0_71, %c0_72] : memref<32x1xf32, #tpu.memory_space<vmem>>, vector<32x1xf32>
    %211 = vector.broadcast %210 : vector<32x1xf32> to vector<32x128xf32>
    %212 = arith.addf %209, %211 : vector<32x128xf32>
    %cst_73 = arith.constant 0.000000e+00 : f32
    %213 = vector.broadcast %cst_73 : f32 to vector<32x128xf32>
    %214 = arith.maximumf %212, %213 : vector<32x128xf32>
    %c0_74 = arith.constant 0 : index
    %c0_75 = arith.constant 0 : index
    %215 = vector.load %arg12[%c0_74, %c0_75] : memref<32x32xbf16, #tpu.memory_space<vmem>>, vector<32x32xbf16>
    %216 = arith.truncf %214 : vector<32x128xf32> to vector<32x128xbf16>
    %cst_76 = arith.constant dense<0.000000e+00> : vector<32x128xf32>
    %217 = tpu.matmul %215, %216, %cst_76 {dimension_numbers = #tpu.dot_dimension_numbers<[1], [0], [0], [1], [0, 0, 1, 1], [], []>} : vector<32x32xbf16>, vector<32x128xbf16>, vector<32x128xf32> -> vector<32x128xf32>
    %c0_77 = arith.constant 0 : index
    %c0_78 = arith.constant 0 : index
    %218 = vector.load %arg13[%c0_77, %c0_78] : memref<32x1xf32, #tpu.memory_space<vmem>>, vector<32x1xf32>
    %219 = vector.broadcast %218 : vector<32x1xf32> to vector<32x128xf32>
    %220 = arith.addf %217, %219 : vector<32x128xf32>
    %cst_79 = arith.constant 0.000000e+00 : f32
    %221 = vector.broadcast %cst_79 : f32 to vector<32x128xf32>
    %222 = arith.maximumf %220, %221 : vector<32x128xf32>
    %c9_80 = arith.constant 9 : index
    %c0_81 = arith.constant 0 : index
    %223 = vector.load %arg2[%c9_80, %c0_81] : memref<10x128xf32, #tpu.memory_space<vmem>>, vector<1x128xf32>
    %224 = vector.broadcast %223 : vector<1x128xf32> to vector<32x128xf32>
    %225 = arith.mulf %222, %224 : vector<32x128xf32>
    %c0_82 = arith.constant 0 : index
    %c0_83 = arith.constant 0 : index
    %c0_84 = arith.constant 0 : index
    %226 = vector.load %arg14[%c0_82, %c0_83, %c0_84] : memref<1x32x128xf32, #tpu.memory_space<vmem>>, vector<1x32x128xf32>
    %227 = vector.shape_cast %226 : vector<1x32x128xf32> to vector<32x128xf32>
    %228 = vector.shape_cast %225 : vector<32x128xf32> to vector<1x32x128xf32>
    tpu.vector_store %arg14[%c0_82, %c0_83, %c0_84], %228 {strides = array<i32>} : memref<1x32x128xf32, #tpu.memory_space<vmem>>, vector<1x32x128xf32>,
    return
  }
  func.func @transform_0(%arg0: i32) -> (i32, i32, i32) {
    %c0_i32 = arith.constant 0 : i32
    %c0_i32_0 = arith.constant 0 : i32
    %c0_i32_1 = arith.constant 0 : i32
    return %arg0, %c0_i32, %c0_i32_0 : i32, i32, i32
  }
  func.func @transform_1(%arg0: i32) -> (i32, i32) {
    %c0_i32 = arith.constant 0 : i32
    %c0_i32_0 = arith.constant 0 : i32
    %c0_i32_1 = arith.constant 0 : i32
    return %c0_i32, %c0_i32_0 : i32, i32
  }
  func.func @transform_2(%arg0: i32) -> (i32, i32) {
    %c0_i32 = arith.constant 0 : i32
    %c0_i32_0 = arith.constant 0 : i32
    %c0_i32_1 = arith.constant 0 : i32
    return %c0_i32, %c0_i32_0 : i32, i32
  }
  func.func @transform_3(%arg0: i32) -> (i32, i32) {
    %c0_i32 = arith.constant 0 : i32
    %c0_i32_0 = arith.constant 0 : i32
    %c0_i32_1 = arith.constant 0 : i32
    return %c0_i32, %c0_i32_0 : i32, i32
  }
  func.func @transform_4(%arg0: i32) -> (i32, i32) {
    %c0_i32 = arith.constant 0 : i32
    %c0_i32_0 = arith.constant 0 : i32
    %c0_i32_1 = arith.constant 0 : i32
    return %c0_i32, %c0_i32_0 : i32, i32
  }
  func.func @transform_5(%arg0: i32) -> (i32, i32) {
    %c0_i32 = arith.constant 0 : i32
    %c0_i32_0 = arith.constant 0 : i32
    %c0_i32_1 = arith.constant 0 : i32
    return %c0_i32, %c0_i32_0 : i32, i32
  }
  func.func @transform_6(%arg0: i32) -> (i32, i32) {
    %c0_i32 = arith.constant 0 : i32
    %c0_i32_0 = arith.constant 0 : i32
    %c0_i32_1 = arith.constant 0 : i32
    return %c0_i32, %c0_i32_0 : i32, i32
  }
  func.func @transform_7(%arg0: i32) -> (i32, i32) {
    %c0_i32 = arith.constant 0 : i32
    %c0_i32_0 = arith.constant 0 : i32
    %c0_i32_1 = arith.constant 0 : i32
    return %c0_i32, %c0_i32_0 : i32, i32
  }
  func.func @transform_8(%arg0: i32) -> (i32, i32) {
    %c0_i32 = arith.constant 0 : i32
    %c0_i32_0 = arith.constant 0 : i32
    %c0_i32_1 = arith.constant 0 : i32
    return %c0_i32, %c0_i32_0 : i32, i32
  }
  func.func @transform_9(%arg0: i32) -> (i32, i32) {
    %c0_i32 = arith.constant 0 : i32
    %c0_i32_0 = arith.constant 0 : i32
    %c0_i32_1 = arith.constant 0 : i32
    return %c0_i32, %c0_i32_0 : i32, i32
  }
  func.func @transform_10(%arg0: i32) -> (i32, i32) {
    %c0_i32 = arith.constant 0 : i32
    %c0_i32_0 = arith.constant 0 : i32
    %c0_i32_1 = arith.constant 0 : i32
    return %c0_i32, %c0_i32_0 : i32, i32
  }
  func.func @transform_11(%arg0: i32) -> (i32, i32) {
    %c0_i32 = arith.constant 0 : i32
    %c0_i32_0 = arith.constant 0 : i32
    %c0_i32_1 = arith.constant 0 : i32
    return %c0_i32, %c0_i32_0 : i32, i32
  }
  func.func @transform_12(%arg0: i32) -> (i32, i32) {
    %c0_i32 = arith.constant 0 : i32
    %c0_i32_0 = arith.constant 0 : i32
    %c0_i32_1 = arith.constant 0 : i32
    return %c0_i32, %c0_i32_0 : i32, i32
  }
  func.func @transform_13(%arg0: i32) -> (i32, i32, i32) {
    %c0_i32 = arith.constant 0 : i32
    %c0_i32_0 = arith.constant 0 : i32
    %c0_i32_1 = arith.constant 0 : i32
    return %arg0, %c0_i32, %c0_i32_0 : i32, i32, i32
  }
}

</mosaic_0001>

<bundles_post_ra>
// kernel: singe_prototype_forward.1
= control target key start
LH: loop header
LB: loop body
LE: loop exit
PB: predicated region body
PF: predicated region fallthrough
CT: control target
= control target key end

     0   :  { %vm49_vm0 = vcmask 523264   ;;  %s1772_s29 = smov 64   ;;  %vm90_vm1 = vcmask 7168   ;;  %vm103_vm2 = vcmask 261120   ;;  %v1773_v36 = vmov 1   ;;  %s1775_s26 = smov 120   ;;  %s2249_s0 = inlined_call_operand.vmem [shape: f32[1,32,128], index: 0, kind: input, shape index: {}]   ;;  %s2250_s2 = inlined_call_operand.vmem [shape: f32[32,32], index: 2, kind: input, shape index: {}]   ;;  %s2251_s1 = inlined_call_operand.vmem [shape: f32[10,128], index: 1, kind: input, shape index: {}]   ;;  %s2252_s3 = inlined_call_operand.vmem [shape: bf16[8,288], index: 3, kind: input, shape index: {}]   ;;  %s2253_s4 = inlined_call_operand.vmem [shape: f32[8,1], index: 4, kind: input, shape index: {}]   ;;  %s2254_s5 = inlined_call_operand.vmem [shape: f32[8,32], index: 5, kind: input, shape index: {}]   ;;  %s2255_s7 = inlined_call_operand.vmem [shape: f32[32,1], index: 7, kind: input, shape index: {}]   ;;  %s2256_s10 = inlined_call_operand.vmem [shape: f32[32,1], index: 10, kind: input, shape index: {}]   ;;  %s2257_s6 = inlined_call_operand.vmem [shape: bf16[32,256], index: 6, kind: input, shape index: {}]   ;;  %s2258_s8 = inlined_call_operand.vmem [shape: bf16[32,32], index: 8, kind: input, shape index: {}]   ;;  %s2259_s9 = inlined_call_operand.vmem [shape: bf16[32,32], index: 9, kind: input, shape index: {}]   ;;  %s2260_s12 = inlined_call_operand.vmem [shape: f32[32,1], index: 12, kind: input, shape index: {}]   ;;  %s2261_s11 = inlined_call_operand.vmem [shape: bf16[32,32], index: 11, kind: input, shape index: {}]   ;;  %s2262_s13 = inlined_call_operand.vmem [shape: f32[1,32,128], index: 13, kind: output, shape index: {}]  }
   0x1   :  { %v1858_v0 = vld [vmem:[%s2249_s0 + $0x18] sm:$0xff]  ;;  %v1863_v1 = vld [vmem:[%s2249_s0 + $0x8] sm:$0xff]  ;;  %v1874_v3 = vld [vmem:[%s2249_s0 + $0x10] sm:$0xff]  ;;  %1678 = vset.pattern.permute.xlu1 %v1773_v36  ;;  %v1774_v37 = vmov 0   ;;  %s1776_s27 = smov 1   ;;  %s1777_s28 = smov 121  }
   0x2   :  { %72 = vrot.lane.b32.xlu0 %v1858_v0, %s1772_s29  ;;  %68 = vrot.lane.b32.xlu1 %v1863_v1, %s1772_s29  ;;  %v59_v2 = vsel %vm49_vm0, %v1858_v0, 0.0  ;;  %v1879_v4 = vld [vmem:[%s2249_s0] sm:$0xff]  ;;  %v56_v5 = vsel %vm49_vm0, %v1874_v3, 0.0  ;;  %v53_v8 = vsel %vm49_vm0, %v1863_v1, 0.0  ;;  %v100_v33 = vld [vmem:[%s2250_s2 + $0x8] sm:$0xff]  ;;  %s1778_s30 = smov 7  }
   0x3   :  { %60 = vadd.xlane.f32.xlu2 %v59_v2  ;;  %v50_v11 = vsel %vm49_vm0, %v1879_v4, 0.0  ;;  %v99_v32 = vld [vmem:[%s2250_s2] sm:$0xff]  ;;  %v101_v34 = vld [vmem:[%s2250_s2 + $0x10] sm:$0xff]  ;;  %v102_v35 = vld [vmem:[%s2250_s2 + $0x18] sm:$0xff]  ;;  %1677 = vset.pattern.permute.xlu0 %v1774_v37  ;;  %s1779_s14 = smov 127   ;;  %s1780_s15 = smov 8  }
   0x4   :  { %1676 = vset.pattern.permute.xlu2 %v1774_v37  ;;  %s1781_s16 = smov 9   ;;  %s1782_s0 = smov 119  }
   0x5   :  { %s1784_s23 = smov 32  }
   0xa   :  { %70 = vrot.lane.b32.xlu0 %v1874_v3, %s1772_s29  ;;  %66 = vrot.lane.b32.xlu1 %v1879_v4, %s1772_s29 }
  0x34   :  { %57 = vadd.xlane.f32.xlu0 %v56_v5 }
  0x74   :  { %v73_v6 = vpop.permute.xlu0 %72  ;;  %v69_v12 = vpop.permute.xlu1 %68 }
  0x75   :  { %v87_v7 = vsel %vm49_vm0, %v73_v6, 0.0  ;;  %v81_v13 = vsel %vm49_vm0, %v69_v12, 0.0 }
  0x76   :  { %88 = vadd.xlane.f32.xlu2 %v87_v7  ;;  %v61_v16 = vpop.xlane.xlu2 %60 }
  0x7c   :  { %v71_v9 = vpop.permute.xlu0 %70  ;;  %v67_v14 = vpop.permute.xlu1 %66 }
  0x7d   :  { %v84_v10 = vsel %vm49_vm0, %v71_v9, 0.0  ;;  %v78_v15 = vsel %vm49_vm0, %v67_v14, 0.0 }
  0x7e   :  { %54 = vadd.xlane.f32.xlu2 %v53_v8  ;;  %85 = vadd.xlane.f32.xlu1 %v84_v10 }
  0x86   :  { %51 = vadd.xlane.f32.xlu2 %v50_v11 }
  0x8e   :  { %82 = vadd.xlane.f32.xlu2 %v81_v13 }
  0x96   :  { %79 = vadd.xlane.f32.xlu2 %v78_v15 }
  0xa7   :  { %v58_v20 = vpop.xlane.xlu0 %57 }
  0xe9   :  { %v89_v17 = vpop.xlane.xlu2 %88 }
  0xea   :  { %v94_v18 = vsel %vm90_vm1, %v61_v16, %v89_v17 }
  0xeb   :  { %v98_v19 = vmul.f32 0.015625, %v94_v18 }
  0xed   :  { %128 = vmatpush.msra.mxu0 %v98_v19 }
  0xf1   :  { %v55_v21 = vpop.xlane.xlu2 %54  ;;  %v86_v22 = vpop.xlane.xlu1 %85 }
  0xf2   :  { %v93_v23 = vsel %vm90_vm1, %v58_v20, %v86_v22 }
  0xf3   :  { %v97_v24 = vmul.f32 0.015625, %v93_v23 }
  0xf5   :  { %129 = vmatpush.msra.mxu0 %v97_v24 }
  0xf9   :  { %v52_v25 = vpop.xlane.xlu2 %51 }
 0x101   :  { %v83_v26 = vpop.xlane.xlu2 %82 }
 0x102   :  { %v92_v27 = vsel %vm90_vm1, %v55_v21, %v83_v26 }
 0x103   :  { %v96_v28 = vmul.f32 0.015625, %v92_v27 }
 0x105   :  { %130 = vmatpush.msra.mxu0 %v96_v28 }
 0x109   :  { %v80_v29 = vpop.xlane.xlu2 %79 }
 0x10a   :  { %v91_v30 = vsel %vm90_vm1, %v52_v25, %v80_v29 }
 0x10b   :  { %v95_v31 = vmul.f32 0.015625, %v91_v30 }
 0x10d   :  { %131 = vmatpush.msra.mxu0 %v95_v31 }
 0x10e   :  { %1390 = vmatmul.msk.f32.vlgmr.msra.gmra.mxu0 %vm103_vm2, %v99_v32 }
 0x116   :  { %1391 = vmatmul.msk.f32.gmra.mxu0 %vm103_vm2, %v100_v33 }
 0x11e   :  { %1392 = vmatmul.msk.f32.gmra.mxu0 %vm103_vm2, %v101_v34 }
 0x126   :  { %1393 = vmatmul.msk.f32.gmra.mxu0 %vm103_vm2, %v102_v35 }
 0x18b   :  { %v133_v38 = vpop.f32.mrf.mxu0 }
 0x18c   :  { %v1394_v39 = vmul.f32 -1.442695, %v133_v38 }
 0x18e   :  { %1726 = vpow2.f32 %v1394_v39 }
 0x193   :  { %v136_v40 = vpop.f32.mrf.mxu0 }
 0x194   :  { %v1727_v41 = vpop.eup %1726  ;;  %v1395_v42 = vmul.f32 -1.442695, %v136_v40 }
 0x195   :  { %v157_v43 = vadd.f32 1.0, %v1727_v41 }
 0x196   :  { %1728 = vpow2.f32 %v1395_v42 }
 0x197   :  { %1730 = vrcp.f32 %v157_v43  ;;  %v172_v51 = vand.u32 2147483648, %v157_v43  ;;  %v170_v53 = vand.u32 2147483647, %v157_v43  ;;  %vm166_vm4 = vweird.f32 %v157_v43 }
 0x199   :  { %v173_v60 = vor.u32 1.1754944e-38, %v172_v51  ;;  %vm171_vm6 = vcmp.eq.f32.partialorder %v170_v53, 8.507059e+37 }
 0x19b   :  { %v139_v44 = vpop.f32.mrf.mxu0 }
 0x19c   :  { %v1729_v45 = vpop.eup %1728  ;;  %v1396_v46 = vmul.f32 -1.442695, %v139_v44 }
 0x19d   :  { %v1731_v47 = vpop.eup %1730  ;;  %v158_v48 = vadd.f32 1.0, %v1729_v45 }
 0x19e   :  { %1732 = vpow2.f32 %v1396_v46  ;;  %v162_v49 = vmul.f32 %v1731_v47, %v157_v43  ;;  %vm167_vm3 = vweird.f32 %v1731_v47 }
 0x19f   :  { %1734 = vrcp.f32 %v158_v48  ;;  %vm168_vm5 = vmor %vm166_vm4, %vm167_vm3  ;;  %v187_v5 = vand.u32 2147483648, %v158_v48  ;;  %v185_v7 = vand.u32 2147483647, %v158_v48  ;;  %vm181_vm8 = vweird.f32 %v158_v48 }
 0x1a0   :  { %v163_v50 = vsub.f32 1.0, %v162_v49 }
 0x1a1   :  { %v188_v12 = vor.u32 1.1754944e-38, %v187_v5  ;;  %vm186_vm10 = vcmp.eq.f32.partialorder %v185_v7, 8.507059e+37 }
 0x1a2   :  { %v164_v52 = vmul.f32 %v1731_v47, %v163_v50 }
 0x1a3   :  { %v142_v54 = vpop.f32.mrf.mxu0 }
 0x1a4   :  { %v1733_v55 = vpop.eup %1732  ;;  %v1397_v56 = vmul.f32 -1.442695, %v142_v54  ;;  %v165_v57 = vadd.f32 %v1731_v47, %v164_v52 }
 0x1a5   :  { %v1735_v58 = vpop.eup %1734  ;;  %v159_v59 = vadd.f32 1.0, %v1733_v55 }
 0x1a6   :  { %1736 = vpow2.f32 %v1397_v56  ;;  %v169_v61 = vsel %vm168_vm5, %v1731_v47, %v165_v57  ;;  %v177_v62 = vmul.f32 %v1735_v58, %v158_v48  ;;  %vm182_vm7 = vweird.f32 %v1735_v58 }
 0x1a7   :  { %1738 = vrcp.f32 %v159_v59  ;;  %v174_v63 = vsel %vm171_vm6, %v173_v60, %v169_v61  ;;  %vm183_vm9 = vmor %vm181_vm8, %vm182_vm7  ;;  %v202_v17 = vand.u32 2147483648, %v159_v59  ;;  %v200_v19 = vand.u32 2147483647, %v159_v59 }
 0x1a8   :  { %242 = vperm.xlu1 %1678, %v174_v63   ;;  %223 = vperm.xlu2 %1676, %v174_v63   ;;  %v178_v2 = vsub.f32 1.0, %v177_v62  ;;  %vm196_vm12 = vweird.f32 %v159_v59 }
 0x1a9   :  { %v203_v22 = vor.u32 1.1754944e-38, %v202_v17  ;;  %vm201_vm14 = vcmp.eq.f32.partialorder %v200_v19, 8.507059e+37 }
 0x1aa   :  { %v179_v6 = vmul.f32 %v1735_v58, %v178_v2 }
 0x1ac   :  { %v1737_v8 = vpop.eup %1736  ;;  %v180_v9 = vadd.f32 %v1735_v58, %v179_v6 }
 0x1ad   :  { %v1739_v10 = vpop.eup %1738  ;;  %v160_v11 = vadd.f32 1.0, %v1737_v8 }
 0x1ae   :  { %v184_v13 = vsel %vm183_vm9, %v1735_v58, %v180_v9  ;;  %v192_v14 = vmul.f32 %v1739_v10, %v159_v59  ;;  %vm197_vm11 = vweird.f32 %v1739_v10 }
 0x1af   :  { %1740 = vrcp.f32 %v160_v11  ;;  %v189_v15 = vsel %vm186_vm10, %v188_v12, %v184_v13  ;;  %vm198_vm13 = vmor %vm196_vm12, %vm197_vm11  ;;  %v217_v27 = vand.u32 2147483648, %v160_v11  ;;  %v215_v29 = vand.u32 2147483647, %v160_v11 }
 0x1b0   :  { %1679 = vset.pattern.permute.xlu2 %v1773_v36  ;;  %228 = vperm.xlu0 %1677, %v189_v15   ;;  %v193_v16 = vsub.f32 1.0, %v192_v14  ;;  %vm211_vm1 = vweird.f32 %v160_v11 }
 0x1b1   :  { %246 = vperm.xlu2 %1679, %v189_v15   ;;  %v218_v31 = vor.u32 1.1754944e-38, %v217_v27  ;;  %vm216_vm4 = vcmp.eq.f32.partialorder %v215_v29, 8.507059e+37 }
 0x1b2   :  { %v194_v18 = vmul.f32 %v1739_v10, %v193_v16 }
 0x1b4   :  { %v195_v20 = vadd.f32 %v1739_v10, %v194_v18 }
 0x1b5   :  { %v1741_v21 = vpop.eup %1740 }
 0x1b6   :  { %v199_v23 = vsel %vm198_vm13, %v1739_v10, %v195_v20  ;;  %v207_v24 = vmul.f32 %v1741_v21, %v160_v11  ;;  %vm212_vm15 = vweird.f32 %v1741_v21  ;;  %v1724_v11 = vld [vmem:[%s2251_s1 + $0x4] ss:$0 sm:$0xff] }
 0x1b7   :  { %v204_v25 = vsel %vm201_vm14, %v203_v22, %v199_v23  ;;  %vm213_vm3 = vmor %vm211_vm1, %vm212_vm15 }
 0x1b8   :  { %250 = vperm.xlu1 %1678, %v204_v25   ;;  %v208_v26 = vsub.f32 1.0, %v207_v24 }
 0x1b9   :  { %1680 = vset.pattern.permute.xlu2 %v1774_v37 }
 0x1ba   :  { %233 = vperm.xlu2 %1680, %v204_v25   ;;  %v209_v28 = vmul.f32 %v1741_v21, %v208_v26 }
 0x1bc   :  { %v210_v30 = vadd.f32 %v1741_v21, %v209_v28 }
 0x1be   :  { %v214_v32 = vsel %vm213_vm3, %v1741_v21, %v210_v30 }
 0x1bf   :  { %v219_v33 = vsel %vm216_vm4, %v218_v31, %v214_v32 }
 0x1c0   :  { %254 = vperm.xlu1 %1678, %v219_v33  }
 0x1c2   :  { %238 = vperm.xlu2 %1680, %v219_v33  }
 0x1c8   :  { %1681 = vset.pattern.permute.xlu1 %v1774_v37 }
 0x202   :  { %v224_v34 = vpop.permute.xlu2 %223 }
 0x20b   :  { %v247_v35 = vpop.permute.xlu2 %246 }
 0x214   :  { %v234_v45 = vpop.permute.xlu2 %233 }
 0x21a   :  { %v243_v38 = vpop.permute.xlu1 %242 }
 0x21b   :  { %v257_v39 = vsel %vm49_vm0, %v224_v34, %v243_v38  ;;  %v1717_v38 = vld [vmem:[%s2251_s1 + $0x3] ss:$0 sm:$0xff] }
 0x21c   :  { %v1924_v42 = vmul.f32 %v257_v39, %v1879_v4  ;;  %v239_v50 = vpop.permute.xlu2 %238 }
 0x21e   :  { %v265_v4 = vmul.f32 %v1924_v42, %v1924_v42 }
 0x222   :  { %v229_v40 = vpop.permute.xlu0 %228 }
 0x223   :  { %v258_v41 = vsel %vm49_vm0, %v229_v40, %v247_v35  ;;  %v1716_v35 = vld [vmem:[%s2251_s1 + $0x7] ss:$0 sm:$0xff] }
 0x224   :  { %v1927_v43 = vmul.f32 %v258_v41, %v1863_v1 }
 0x226   :  { %v1240_v44 = vpack.c.bf16 %v1927_v43, %v1924_v42  ;;  %v266_v49 = vmul.f32 %v1927_v43, %v1927_v43 }
 0x228   :  { %v269_v53 = vadd.f32 %v266_v49, %v265_v4 }
 0x22a   :  { %v251_v46 = vpop.permute.xlu1 %250 }
 0x22b   :  { %v259_v47 = vsel %vm49_vm0, %v234_v45, %v251_v46 }
 0x22c   :  { %v1933_v48 = vmul.f32 %v259_v47, %v1874_v3 }
 0x22e   :  { %v267_v1 = vmul.f32 %v1933_v48, %v1933_v48 }
 0x230   :  { %v270_v55 = vadd.f32 %v269_v53, %v267_v1 }
 0x232   :  { %v255_v51 = vpop.permute.xlu1 %254 }
 0x233   :  { %v260_v52 = vsel %vm49_vm0, %v239_v50, %v255_v51 }
 0x234   :  { %v1943_v54 = vmul.f32 %v260_v52, %v1858_v0 }
 0x236   :  { %v268_v3 = vmul.f32 %v1943_v54, %v1943_v54  ;;  %v1241_v56 = vpack.c.bf16 %v1943_v54, %v1933_v48 }
 0x238   :  { %v271_v57 = vadd.f32 %v270_v55, %v268_v3 }
 0x23a   :  { %v272_v58 = vrot.slane %v271_v57, 4 }
 0x23c   :  { %v273_v59 = vadd.f32 %v272_v58, %v271_v57  ;;  %v1718_v58 = vld [vmem:[%s2251_s1 + $0x6] ss:$0 sm:$0xff] }
 0x23e   :  { %v274_v60 = vrot.slane %v273_v59, 2 }
 0x240   :  { %v275_v61 = vadd.f32 %v274_v60, %v273_v59 }
 0x242   :  { %v276_v62 = vrot.slane %v275_v61, 1 }
 0x244   :  { %v277_v63 = vadd.f32 %v276_v62, %v275_v61 }
 0x246   :  { %v278_v2 = vmax.f32 %v277_v63, 1e-24 }
 0x248   :  { %1742 = vrsqrt.f32 %v278_v2  ;;  %vm285_vm6 = vweird.f32 %v278_v2 }
 0x24e   :  { %v1743_v5 = vpop.eup %1742 }
 0x24f   :  { %v280_v6 = vmul.f32 %v1743_v5, %v278_v2  ;;  %vm286_vm5 = vweird.f32 %v1743_v5 }
 0x250   :  { %vm287_vm7 = vmor %vm285_vm6, %vm286_vm5  ;;  %vm817_vm6 = vcmask 785408  }
 0x251   :  { %v281_v0 = vmul.f32 %v1743_v5, %v280_v6 }
 0x253   :  { %v282_v7 = vmul.f32 0.5, %v281_v0 }
 0x255   :  { %v283_v8 = vsub.f32 1.5, %v282_v7 }
 0x257   :  { %v284_v9 = vmul.f32 %v1743_v5, %v283_v8 }
 0x259   :  { %v288_v10 = vsel %vm287_vm7, %v1743_v5, %v284_v9  ;;  %v1719_v9 = vld [vmem:[%s2251_s1 + $0x2] ss:$0 sm:$0xff]  ;;  %vm939_vm7 = vcmask 1040384  }
 0x25a   :  { %v289_v12 = vmul.f32 %v288_v10, %v1924_v42  ;;  %v290_v13 = vmul.f32 %v288_v10, %v1927_v43  ;;  %v291_v14 = vmul.f32 %v288_v10, %v1933_v48  ;;  %v292_v15 = vmul.f32 %v288_v10, %v1943_v54  ;;  %v1545_v42 = vld [vmem:[%s2257_s6 + $0x4] sm:$0xf]  ;;  %v1477_v43 = vld [vmem:[%s2257_s6 + $0x8] sm:$0xf0] }
 0x25c   :  { %445 = vrot.lane.b32.xlu0 %v292_v15, %s1775_s26  ;;  %363 = vrot.lane.b32.xlu1 %v291_v14, %s1776_s27  ;;  %v385_v16 = vmul.f32 %v1724_v11, %v291_v14  ;;  %v386_v17 = vmul.f32 %v1724_v11, %v292_v15  ;;  %v383_v18 = vmul.f32 %v1724_v11, %v289_v12 }
 0x25d   :  { %443 = vrot.lane.b32.xlu2 %v291_v14, %s1775_s26  ;;  %v384_v19 = vmul.f32 %v1724_v11, %v290_v13  ;;  %v708_v22 = vpack.c.bf16 %v289_v12, %v289_v12  ;;  %v709_v23 = vpack.c.bf16 %v290_v13, %v290_v13  ;;  %v710_v24 = vpack.c.bf16 %v291_v14, %v291_v14 }
 0x25e   :  { %v1603_v20 = vpack.c.bf16 %v386_v17, %v385_v16  ;;  %v711_v25 = vpack.c.bf16 %v292_v15, %v292_v15 }
 0x25f   :  { %v1598_v21 = vpack.c.bf16 %v384_v19, %v383_v18  ;;  %v717_v26 = vunpack.c.l.b16 %v708_v22  ;;  %v718_v27 = vunpack.c.l.b16 %v709_v23  ;;  %v719_v28 = vunpack.c.l.b16 %v710_v24 }
 0x260   :  { %1653 = vst [vmem:[#allocation2 + $0x40] sm:$0xff] %v1603_v20   ;;  %v720_v29 = vunpack.c.l.b16 %v711_v25 }
 0x261   :  { %1652 = vst [vmem:[#allocation2 + $0x88] sm:$0xff] %v1598_v21   ;;  %v1956_v30 = vpack.c.b16 %v718_v27, %v717_v26 }
 0x262   :  { %v1958_v31 = vpack.c.b16 %v720_v29, %v719_v28  ;;  %v1721_v28 = vld [vmem:[%s2251_s1 + $0x5] ss:$0 sm:$0xff] }
 0x264   :  { %441 = vrot.lane.b32.xlu1 %v290_v13, %s1775_s26  ;;  %439 = vrot.lane.b32.xlu0 %v289_v12, %s1775_s26 }
 0x265   :  { %365 = vrot.lane.b32.xlu2 %v292_v15, %s1776_s27 }
 0x26c   :  { %421 = vrot.lane.b32.xlu1 %v291_v14, %s1777_s28  ;;  %361 = vrot.lane.b32.xlu0 %v290_v13, %s1776_s27 }
 0x26d   :  { %359 = vrot.lane.b32.xlu2 %v289_v12, %s1776_s27 }
 0x274   :  { %343 = vrot.lane.b32.xlu1 %v292_v15, %s1778_s30  ;;  %341 = vrot.lane.b32.xlu0 %v291_v14, %s1778_s30 }
 0x275   :  { %423 = vrot.lane.b32.xlu2 %v292_v15, %s1777_s28 }
 0x27c   :  { %337 = vrot.lane.b32.xlu1 %v289_v12, %s1778_s30  ;;  %419 = vrot.lane.b32.xlu0 %v290_v13, %s1777_s28 }
 0x27d   :  { %417 = vrot.lane.b32.xlu2 %v289_v12, %s1777_s28 }
 0x284   :  { %401 = vrot.lane.b32.xlu1 %v292_v15, %s1779_s14  ;;  %399 = vrot.lane.b32.xlu0 %v291_v14, %s1779_s14 }
 0x285   :  { %339 = vrot.lane.b32.xlu2 %v290_v13, %s1778_s30 }
 0x28c   :  { %395 = vrot.lane.b32.xlu1 %v289_v12, %s1779_s14  ;;  %321 = vrot.lane.b32.xlu0 %v292_v15, %s1780_s15 }
 0x28d   :  { %319 = vrot.lane.b32.xlu2 %v291_v14, %s1780_s15 }
 0x294   :  { %317 = vrot.lane.b32.xlu1 %v290_v13, %s1780_s15  ;;  %315 = vrot.lane.b32.xlu0 %v289_v12, %s1780_s15 }
 0x295   :  { %397 = vrot.lane.b32.xlu2 %v290_v13, %s1779_s14 }
 0x29c   :  { %297 = vrot.lane.b32.xlu1 %v291_v14, %s1781_s16  ;;  %467 = vrot.lane.b32.xlu0 %v292_v15, %s1782_s0 }
 0x29d   :  { %465 = vrot.lane.b32.xlu2 %v291_v14, %s1782_s0 }
 0x2a4   :  { %463 = vrot.lane.b32.xlu1 %v290_v13, %s1782_s0  ;;  %461 = vrot.lane.b32.xlu0 %v289_v12, %s1782_s0 }
 0x2a5   :  { %299 = vrot.lane.b32.xlu2 %v292_v15, %s1781_s16 }
 0x2ac   :  { %295 = vrot.lane.b32.xlu0 %v290_v13, %s1781_s16 }
 0x2ad   :  { %293 = vrot.lane.b32.xlu2 %v289_v12, %s1781_s16 }
 0x2b4   :  { %827 = vrot.lane.b32.xlu0 %v1956_v30, %s1772_s29 }
 0x2b5   :  { %829 = vrot.lane.b32.xlu2 %v1958_v31, %s1772_s29 }
 0x2b7   :  { %v444_v32 = vpop.permute.xlu2 %443 }
 0x2b8   :  { %v451_v41 = vmul.f32 %v1716_v35, %v444_v32 }
 0x2bf   :  { %v366_v33 = vpop.permute.xlu2 %365 }
 0x2c0   :  { %v372_v45 = vmul.f32 %v1717_v38, %v366_v33 }
 0x2c7   :  { %v360_v34 = vpop.permute.xlu2 %359 }
 0x2c8   :  { %v369_v62 = vmul.f32 %v1717_v38, %v360_v34 }
 0x2ce   :  { %v446_v39 = vpop.permute.xlu0 %445  ;;  %v364_v40 = vpop.permute.xlu1 %363 }
 0x2cf   :  { %v452_v46 = vmul.f32 %v1716_v35, %v446_v39  ;;  %v371_v47 = vmul.f32 %v1717_v38, %v364_v40  ;;  %v424_v49 = vpop.permute.xlu2 %423  ;;  %v1720_v40 = vld [vmem:[%s2251_s1 + $0x1] ss:$0 sm:$0xff] }
 0x2d0   :  { %v430_v63 = vmul.f32 %v1718_v58, %v424_v49 }
 0x2d1   :  { %v1633_v4 = vpack.c.bf16 %v452_v46, %v451_v41  ;;  %v1593_v50 = vpack.c.bf16 %v372_v45, %v371_v47 }
 0x2d3   :  { %1659 = vst [vmem:[#allocation2 + $0x18] sm:$0xff] %v1633_v4  }
 0x2d4   :  { %1651 = vst [vmem:[#allocation2 + $0x80] sm:$0xff] %v1593_v50  }
 0x2d6   :  { %v442_v1 = vpop.permute.xlu1 %441  ;;  %v440_v51 = vpop.permute.xlu0 %439 }
 0x2d7   :  { %v450_v52 = vmul.f32 %v1716_v35, %v442_v1  ;;  %v418_v53 = vpop.permute.xlu2 %417  ;;  %v449_v55 = vmul.f32 %v1716_v35, %v440_v51 }
 0x2d8   :  { %v427_v20 = vmul.f32 %v1718_v58, %v418_v53 }
 0x2d9   :  { %v1628_v3 = vpack.c.bf16 %v450_v52, %v449_v55 }
 0x2da   :  { %v1542_v57 = vld [vmem:[#allocation2 + $0x18] sm:$0xff] }
 0x2db   :  { %1658 = vst [vmem:[#allocation2 + $0x30] sm:$0xff] %v1628_v3   ;;  %v1534_v59 = vld [vmem:[#allocation2 + $0x80] sm:$0xff]  ;;  %661 = vmatpush.bf16.msra.mxu2 %v1542_v57 }
 0x2dc   :  { %648 = vmatpush.bf16.msra.mxu1 %v1534_v59 }
 0x2de   :  { %v422_v60 = vpop.permute.xlu1 %421  ;;  %v362_v61 = vpop.permute.xlu0 %361 }
 0x2df   :  { %v429_v2 = vmul.f32 %v1718_v58, %v422_v60  ;;  %v340_v5 = vpop.permute.xlu2 %339  ;;  %v370_v6 = vmul.f32 %v1717_v38, %v362_v61  ;;  %v1722_v61 = vld [vmem:[%s2251_s1 + $0x8] ss:$0 sm:$0xff] }
 0x2e0   :  { %v348_v21 = vmul.f32 %v1719_v9, %v340_v5  ;;  %v483_v5 = vld [vmem:[%s2252_s3] sm:$0xff] }
 0x2e1   :  { %v1623_v0 = vpack.c.bf16 %v430_v63, %v429_v2  ;;  %v1588_v7 = vpack.c.bf16 %v370_v6, %v369_v62  ;;  %v1723_v63 = vld [vmem:[%s2251_s1] ss:$0 sm:$0xff] }
 0x2e2   :  { %v1541_v8 = vld [vmem:[#allocation2 + $0x30] sm:$0xff] }
 0x2e3   :  { %1657 = vst [vmem:[#allocation2 + $0x48] sm:$0xff] %v1623_v0   ;;  %662 = vmatpush.bf16.msra.mxu2 %v1541_v8  ;;  %v1536_v8 = vld [vmem:[#allocation2 + $0x40] sm:$0xff] }
 0x2e4   :  { %1650 = vst [vmem:[#allocation2 + $0x70] sm:$0xff] %v1588_v7  }
 0x2e6   :  { %v344_v10 = vpop.permute.xlu1 %343  ;;  %v342_v11 = vpop.permute.xlu0 %341 }
 0x2e7   :  { %v350_v12 = vmul.f32 %v1719_v9, %v344_v10  ;;  %v320_v13 = vpop.permute.xlu2 %319  ;;  %v349_v14 = vmul.f32 %v1719_v9, %v342_v11 }
 0x2e8   :  { %v327_v47 = vmul.f32 %v1720_v40, %v320_v13  ;;  %v530_v13 = vunpack.c.h.b16 %v483_v5 }
 0x2e9   :  { %v1583_v15 = vpack.c.bf16 %v350_v12, %v349_v14  ;;  %v521_v14 = vld [vmem:[%s2253_s4] sm:$0xff] }
 0x2ea   :  { %v1540_v16 = vld [vmem:[#allocation2 + $0x48] sm:$0xff]  ;;  %524 = vperm.xlu1 %1681, %v521_v14  }
 0x2eb   :  { %1649 = vst [vmem:[#allocation2 + $0x8] sm:$0xff] %v1583_v15   ;;  %v1533_v17 = vld [vmem:[#allocation2 + $0x70] sm:$0xff]  ;;  %663 = vmatpush.bf16.msra.mxu2 %v1540_v16 }
 0x2ec   :  { %649 = vmatpush.bf16.msra.mxu1 %v1533_v17 }
 0x2ee   :  { %v338_v18 = vpop.permute.xlu1 %337  ;;  %v420_v19 = vpop.permute.xlu0 %419 }
 0x2ef   :  { %v347_v22 = vmul.f32 %v1719_v9, %v338_v18  ;;  %v398_v23 = vpop.permute.xlu2 %397  ;;  %v428_v24 = vmul.f32 %v1718_v58, %v420_v19  ;;  %v1535_v19 = vld [vmem:[#allocation2 + $0x88] sm:$0xff] }
 0x2f0   :  { %v406_v49 = vmul.f32 %v1721_v28, %v398_v23 }
 0x2f1   :  { %v1578_v25 = vpack.c.bf16 %v348_v21, %v347_v22  ;;  %v1618_v26 = vpack.c.bf16 %v428_v24, %v427_v20  ;;  %v533_v20 = vpack.c.b16 %v530_v13, %v530_v13 }
 0x2f2   :  { %v1532_v27 = vld [vmem:[#allocation2 + $0x8] sm:$0xff] }
 0x2f3   :  { %1648 = vst [vmem:[#allocation2 + $0x20] sm:$0xff] %v1578_v25   ;;  %650 = vmatpush.bf16.msra.mxu1 %v1532_v27 }
 0x2f4   :  { %1656 = vst [vmem:[#allocation2 + $0x10] sm:$0xff] %v1618_v26  }
 0x2f6   :  { %v402_v29 = vpop.permute.xlu1 %401  ;;  %v400_v32 = vpop.permute.xlu0 %399 }
 0x2f7   :  { %v408_v33 = vmul.f32 %v1721_v28, %v402_v29  ;;  %v466_v34 = vpop.permute.xlu2 %465  ;;  %v407_v35 = vmul.f32 %v1721_v28, %v400_v32 }
 0x2f8   :  { %v473_v6 = vmul.f32 %v1722_v61, %v466_v34 }
 0x2f9   :  { %v1613_v38 = vpack.c.bf16 %v408_v33, %v407_v35 }
 0x2fa   :  { %v1531_v39 = vld [vmem:[#allocation2 + $0x20] sm:$0xff] }
 0x2fb   :  { %1655 = vst [vmem:[#allocation2 + $0x28] sm:$0xff] %v1613_v38   ;;  %v1539_v41 = vld [vmem:[#allocation2 + $0x10] sm:$0xff]  ;;  %651 = vmatpush.bf16.msra.mxu1 %v1531_v39 }
 0x2fc   :  { %664 = vmatpush.bf16.msra.mxu2 %v1539_v41 }
 0x2fe   :  { %v396_v45 = vpop.permute.xlu1 %395  ;;  %v322_v46 = vpop.permute.xlu0 %321 }
 0x2ff   :  { %v405_v4 = vmul.f32 %v1721_v28, %v396_v45  ;;  %v300_v50 = vpop.permute.xlu2 %299  ;;  %v328_v1 = vmul.f32 %v1720_v40, %v322_v46  ;;  %v484_v28 = vld [vmem:[%s2252_s3 + $0x8] sm:$0xf]  ;;  %v529_v46 = vunpack.c.l.b16 %v483_v5 }
 0x300   :  { %v306_v9 = vmul.f32 %v1723_v63, %v300_v50  ;;  %v531_v34 = vunpack.c.l.b16 %v484_v28 }
 0x301   :  { %v1608_v51 = vpack.c.bf16 %v406_v49, %v405_v4  ;;  %v1573_v52 = vpack.c.bf16 %v328_v1, %v327_v47  ;;  %v532_v49 = vpack.c.b16 %v529_v46, %v529_v46  ;;  %v727_v4 = vsel %vm49_vm0, %v1956_v30, 0 }
 0x302   :  { %v1538_v53 = vld [vmem:[#allocation2 + $0x28] sm:$0xff]  ;;  %v534_v39 = vpack.c.b16 %v531_v34, %v531_v34 }
 0x303   :  { %1654 = vst [vmem:[#allocation2 + $0x50] sm:$0xff] %v1608_v51   ;;  %665 = vmatpush.bf16.msra.mxu2 %v1538_v53 }
 0x304   :  { %1647 = vst [vmem:[#allocation2 + $0x58] sm:$0xff] %v1573_v52  }
 0x306   :  { %v318_v55 = vpop.permute.xlu1 %317  ;;  %v316_v3 = vpop.permute.xlu0 %315 }
 0x307   :  { %v326_v57 = vmul.f32 %v1720_v40, %v318_v55  ;;  %v294_v58 = vpop.permute.xlu2 %293  ;;  %v325_v59 = vmul.f32 %v1720_v40, %v316_v3  ;;  %v730_v40 = vsel %vm49_vm0, %v1958_v31, 0 }
 0x308   :  { %v303_v32 = vmul.f32 %v1723_v63, %v294_v58 }
 0x309   :  { %v1568_v60 = vpack.c.bf16 %v326_v57, %v325_v59 }
 0x30a   :  { %v1537_v62 = vld [vmem:[#allocation2 + $0x50] sm:$0xff] }
 0x30b   :  { %1646 = vst [vmem:[#allocation2 + $0x78] sm:$0xff] %v1568_v60   ;;  %v1530_v2 = vld [vmem:[#allocation2 + $0x58] sm:$0xff]  ;;  %666 = vmatpush.bf16.msra.mxu2 %v1537_v62 }
 0x30c   :  { %652 = vmatpush.bf16.msra.mxu1 %v1530_v2 }
 0x30e   :  { %v298_v0 = vpop.permute.xlu1 %297  ;;  %v468_v7 = vpop.permute.xlu0 %467 }
 0x30f   :  { %v305_v10 = vmul.f32 %v1723_v63, %v298_v0  ;;  %v830_v11 = vpop.permute.xlu2 %829  ;;  %v474_v12 = vmul.f32 %v1722_v61, %v468_v7  ;;  %667 = vmatpush.bf16.msra.mxu2 %v1536_v8 }
 0x310   :  { %v838_v15 = vsel %vm49_vm0, %v830_v11, 0 }
 0x311   :  { %v1563_v16 = vpack.c.bf16 %v306_v9, %v305_v10  ;;  %v1643_v17 = vpack.c.bf16 %v474_v12, %v473_v6  ;;  %846 = vmatpush.bf16.xpose.msrb.mxu0 %v838_v15  ;;  %v2007_v12 = vld [vmem:[%s2251_s1 + $0x9] ss:$0 sm:$0xff] }
 0x312   :  { %v1529_v18 = vld [vmem:[#allocation2 + $0x78] sm:$0xff] }
 0x313   :  { %1645 = vst [vmem:[#allocation2 + $0x38] sm:$0xff] %v1563_v16   ;;  %653 = vmatpush.bf16.msra.mxu1 %v1529_v18  ;;  %668 = vmatpush.bf16.msra.mxu2 %v1535_v19 }
 0x314   :  { %1661 = vst [vmem:[#allocation2 + $0x60] sm:$0xff] %v1643_v17  }
 0x316   :  { %v464_v21 = vpop.permute.xlu1 %463  ;;  %v462_v22 = vpop.permute.xlu0 %461  ;;  %669 = vmatmul.bf16.vlgmr.msra.gmra.mxu2 %v533_v20 }
 0x317   :  { %v472_v23 = vmul.f32 %v1722_v61, %v464_v21  ;;  %v471_v24 = vmul.f32 %v1722_v61, %v462_v22 }
 0x319   :  { %v1638_v25 = vpack.c.bf16 %v472_v23, %v471_v24 }
 0x31a   :  { %v1528_v26 = vld [vmem:[#allocation2 + $0x38] sm:$0xff] }
 0x31b   :  { %1660 = vst [vmem:[#allocation2 + $0x68] sm:$0xff] %v1638_v25   ;;  %v1544_v27 = vld [vmem:[#allocation2 + $0x60] sm:$0xff]  ;;  %654 = vmatpush.bf16.msra.mxu1 %v1528_v26 }
 0x31c   :  { %680 = vmatpush.bf16.msra.mxu3 %v1544_v27  ;;  %v712_v25 = vld [vmem:[%s2254_s5] sm:$0xff]  ;;  %s1783_s5 = smov 96  }
 0x31e   :  { %v296_v29 = vpop.permute.xlu0 %295 }
 0x31f   :  { %v304_v33 = vmul.f32 %v1723_v63, %v296_v29 }
 0x321   :  { %v1558_v35 = vpack.c.bf16 %v304_v33, %v303_v32 }
 0x322   :  { %v1543_v38 = vld [vmem:[#allocation2 + $0x68] sm:$0xff] }
 0x323   :  { %1559 = vst [vmem:[#allocation2] sm:$0xff] %v1558_v35   ;;  %681 = vmatpush.bf16.msra.mxu3 %v1543_v38 }
 0x326   :  { %v828_v41 = vpop.permute.xlu0 %827  ;;  %1470 = vmatmul.msk.bf16.vlgmr.msra.gmra.mxu3 %vm103_vm2, %v534_v39 }
 0x327   :  { %738 = vmatpush.bf16.xpose.msrb.mxu3 %v730_v40  ;;  %v835_v45 = vsel %vm49_vm0, %v828_v41, 0 }
 0x328   :  { %847 = vmatpush.bf16.xpose.msrb.mxu0 %v835_v45 }
 0x32a   :  { %v1527_v47 = vld [vmem:[#allocation2] sm:$0xff] }
 0x32b   :  { %655 = vmatpush.bf16.msra.mxu1 %v1527_v47 }
 0x32e   :  { %656 = vmatmul.bf16.vlgmr.msra.gmra.mxu1 %v532_v49 }
 0x32f   :  { %739 = vmatpush.bf16.xpose.msrb.mxu3 %v727_v4 }
 0x35c   :  { %v525_v31 = vpop.permute.xlu1 %524 }
 0x399   :  { %v670_v50 = vpop.f32.mrf.mxu2 }
 0x3a1   :  { %v672_v1 = vpop.f32.mrf.mxu2 }
 0x3a9   :  { %v683_v51 = vpop.f32.mrf.mxu3 }
 0x3ab   :  { %v657_v52 = vpop.f32.mrf.mxu1 }
 0x3ac   :  { %v658_v53 = vadd.f32 %v657_v52, %v525_v31 }
 0x3ae   :  { %v671_v55 = vadd.f32 %v670_v50, %v658_v53 }
 0x3b0   :  { %v684_v3 = vadd.f32 %v683_v51, %v671_v55 }
 0x3b1   :  { %v685_v57 = vpop.f32.mrf.mxu3 }
 0x3b2   :  { %v687_v58 = vrot.slane %v684_v3, 4 }
 0x3b3   :  { %v659_v59 = vpop.f32.mrf.mxu1 }
 0x3b4   :  { %v688_v60 = vmax.f32 %v684_v3, %v687_v58 }
 0x3b6   :  { %v689_v61 = vrot.slane %v688_v60, 2 }
 0x3b8   :  { %v690_v62 = vmax.f32 %v688_v60, %v689_v61 }
 0x3ba   :  { %v691_v63 = vrot.slane %v690_v62, 1 }
 0x3bc   :  { %v692_v2 = vmax.f32 %v690_v62, %v691_v63 }
 0x3be   :  { %v693_v5 = vsub.f32 %v684_v3, %v692_v2 }
 0x3c0   :  { %v694_v30 = vmul.f32 1.442695, %v693_v5 }
 0x3c2   :  { %1744 = vpow2.f32 %v694_v30 }
 0x3c8   :  { %v1745_v6 = vpop.eup %1744 }
 0x3c9   :  { %v696_v0 = vrot.slane %v1745_v6, 4 }
 0x3cb   :  { %v697_v7 = vadd.f32 %v1745_v6, %v696_v0 }
 0x3cd   :  { %v698_v8 = vrot.slane %v697_v7, 2 }
 0x3cf   :  { %v699_v9 = vadd.f32 %v698_v8, %v697_v7 }
 0x3d1   :  { %v700_v10 = vrot.slane %v699_v9, 1 }
 0x3d3   :  { %v701_v11 = vadd.f32 %v700_v10, %v699_v9 }
 0x3d5   :  { %1746 = vrcp.f32 %v701_v11 }
 0x3db   :  { %v1747_v13 = vpop.eup %1746 }
 0x3dc   :  { %v703_v14 = vmul.f32 %v1747_v13, %v1745_v6 }
 0x3de   :  { %v706_v15 = vmul.f32 %v2007_v12, %v703_v14 }
 0x3e0   :  { %854 = vrot.lane.b32.xlu2 %v706_v15, %s1772_s29  ;;  %v707_v16 = vpack.c.bf16 %v706_v15, %v706_v15  ;;  %v745_v19 = vsel %vm49_vm0, %v706_v15, 0.0 }
 0x3e2   :  { %1471 = vmatmul.msk.bf16.vlgmr.msrb.gmra.mxu3 %vm49_vm0, %v707_v16  ;;  %v823_v17 = vunpack.c.l.b16 %v707_v16 }
 0x3e4   :  { %v824_v18 = vpack.c.b16 %v823_v17, %v823_v17 }
 0x3e6   :  { %825 = vrot.lane.b32.xlu1 %v824_v18, %s1772_s29 }
 0x410   :  { %746 = vadd.xlane.f32.xlu1 %v745_v19 }
 0x43a   :  { %v855_v20 = vpop.permute.xlu2 %854 }
 0x43b   :  { %v857_v21 = vsel %vm49_vm0, %v855_v20, 0.0 }
 0x43c   :  { %858 = vadd.xlane.f32.xlu0 %v857_v21 }
 0x458   :  { %v826_v22 = vpop.permute.xlu1 %825 }
 0x459   :  { %1472 = vmatmul.msk.bf16.vlgmr.msrb.gmra.mxu0 %vm49_vm0, %v826_v22 }
 0x465   :  { %v741_v23 = vpop.f32.mrf.mxu3 }
 0x46d   :  { %v743_v24 = vpop.f32.mrf.mxu3 }
 0x483   :  { %v747_v26 = vpop.xlane.xlu1 %746 }
 0x484   :  { %v748_v27 = vmul.f32 %v747_v26, %v712_v25 }
 0x486   :  { %v749_v28 = vsub.f32 %v741_v23, %v748_v27 }
 0x488   :  { %v750_v29 = vmul.f32 %v749_v28, %v749_v28 }
 0x48a   :  { %v751_v32 = vsel %vm103_vm2, %v750_v29, 0.0 }
 0x48b   :  { %752 = vadd.xlane.f32.xlu0 %v751_v32 }
 0x4af   :  { %v859_v33 = vpop.xlane.xlu0 %858 }
 0x4b0   :  { %v860_v34 = vmul.f32 %v859_v33, %v712_v25 }
 0x4d6   :  { %v849_v35 = vpop.f32.mrf.mxu0 }
 0x4d7   :  { %v861_v38 = vsub.f32 %v849_v35, %v860_v34 }
 0x4d9   :  { %v862_v39 = vmul.f32 %v861_v38, %v861_v38 }
 0x4db   :  { %v863_v40 = vsel %vm103_vm2, %v862_v39, 0.0 }
 0x4dc   :  { %864 = vadd.xlane.f32.xlu2 %v863_v40 }
 0x4de   :  { %v851_v41 = vpop.f32.mrf.mxu0 }
 0x4fe   :  { %v753_v45 = vpop.xlane.xlu0 %752 }
 0x4ff   :  { %v754_v46 = vmax.f32 %v753_v45, 1e-24 }
 0x501   :  { %1748 = vrsqrt.f32 %v754_v46  ;;  %vm761_vm9 = vweird.f32 %v754_v46 }
 0x507   :  { %v1749_v47 = vpop.eup %1748 }
 0x508   :  { %v756_v49 = vmul.f32 %v1749_v47, %v754_v46  ;;  %vm762_vm8 = vweird.f32 %v1749_v47 }
 0x509   :  { %vm763_vm10 = vmor %vm761_vm9, %vm762_vm8 }
 0x50a   :  { %v757_v4 = vmul.f32 %v1749_v47, %v756_v49 }
 0x50c   :  { %v758_v50 = vmul.f32 0.5, %v757_v4 }
 0x50e   :  { %v759_v1 = vsub.f32 1.5, %v758_v50 }
 0x510   :  { %v760_v51 = vmul.f32 %v1749_v47, %v759_v1 }
 0x512   :  { %v764_v31 = vsel %vm763_vm10, %v1749_v47, %v760_v51 }
 0x513   :  { %v765_v52 = vmul.f32 %v764_v31, %v749_v28 }
 0x515   :  { %v766_v53 = vmul.f32 %v765_v52, %v765_v52 }
 0x517   :  { %v767_v55 = vsel %vm103_vm2, %v766_v53, 0.0 }
 0x518   :  { %768 = vadd.xlane.f32.xlu2 %v767_v55 }
 0x54f   :  { %v865_v3 = vpop.xlane.xlu2 %864 }
 0x550   :  { %v866_v57 = vmax.f32 %v865_v3, 1e-24 }
 0x552   :  { %1750 = vrsqrt.f32 %v866_v57  ;;  %vm873_vm12 = vweird.f32 %v866_v57 }
 0x558   :  { %v1751_v58 = vpop.eup %1750 }
 0x559   :  { %v868_v59 = vmul.f32 %v1751_v58, %v866_v57  ;;  %vm874_vm11 = vweird.f32 %v1751_v58  ;;  %v951_v57 = vld [vmem:[%s2255_s7 + $0x18] sm:$0xff] }
 0x55a   :  { %vm875_vm13 = vmor %vm873_vm12, %vm874_vm11 }
 0x55b   :  { %v869_v60 = vmul.f32 %v1751_v58, %v868_v59 }
 0x55d   :  { %v870_v61 = vmul.f32 0.5, %v869_v60 }
 0x55f   :  { %v871_v62 = vsub.f32 1.5, %v870_v61 }
 0x561   :  { %v872_v63 = vmul.f32 %v1751_v58, %v871_v62  ;;  %v948_v62 = vld [vmem:[%s2255_s7] sm:$0xff] }
 0x563   :  { %v876_v2 = vsel %vm875_vm13, %v1751_v58, %v872_v63  ;;  %v950_v63 = vld [vmem:[%s2255_s7 + $0x10] sm:$0xff] }
 0x564   :  { %v877_v5 = vmul.f32 %v876_v2, %v861_v38 }
 0x566   :  { %v878_v30 = vmul.f32 %v877_v5, %v877_v5 }
 0x568   :  { %v879_v6 = vsel %vm103_vm2, %v878_v30, 0.0  ;;  %v1280_v30 = vld [vmem:[%s2256_s10 + $0x18] sm:$0xff] }
 0x569   :  { %880 = vadd.xlane.f32.xlu1 %v879_v6  ;;  %v949_v6 = vld [vmem:[%s2255_s7 + $0x8] sm:$0xff] }
 0x58b   :  { %v769_v0 = vpop.xlane.xlu2 %768 }
 0x58c   :  { %v770_v7 = vrot.slane %v769_v0, 4 }
 0x58e   :  { %v771_v8 = vadd.f32 %v770_v7, %v769_v0  ;;  %v1279_v0 = vld [vmem:[%s2256_s10 + $0x10] sm:$0xff] }
 0x590   :  { %v772_v9 = vrot.slane %v771_v8, 2 }
 0x592   :  { %v773_v10 = vadd.f32 %v772_v9, %v771_v8 }
 0x594   :  { %v774_v11 = vrot.slane %v773_v10, 1 }
 0x596   :  { %v775_v13 = vadd.f32 %v774_v11, %v773_v10 }
 0x598   :  { %v776_v14 = vmax.f32 %v775_v13, 1e-24 }
 0x59a   :  { %1752 = vrsqrt.f32 %v776_v14  ;;  %vm783_vm15 = vweird.f32 %v776_v14 }
 0x5a0   :  { %v1753_v18 = vpop.eup %1752 }
 0x5a1   :  { %v778_v20 = vmul.f32 %v1753_v18, %v776_v14  ;;  %vm784_vm14 = vweird.f32 %v1753_v18 }
 0x5a2   :  { %vm785_vm1 = vmor %vm783_vm15, %vm784_vm14 }
 0x5a3   :  { %v779_v23 = vmul.f32 %v1753_v18, %v778_v20 }
 0x5a5   :  { %v780_v26 = vmul.f32 0.5, %v779_v23 }
 0x5a7   :  { %v781_v27 = vsub.f32 1.5, %v780_v26 }
 0x5a9   :  { %v782_v32 = vmul.f32 %v1753_v18, %v781_v27 }
 0x5ab   :  { %v786_v35 = vsel %vm785_vm1, %v1753_v18, %v782_v32  ;;  %v1546_v32 = vld [vmem:[%s2257_s6 + $0x4] sm:$0xf0] }
 0x5ac   :  { %v2023_v39 = vmul.f32 %v786_v35, %v765_v52 }
 0x5ae   :  { %v797_v46 = vrot.slane %v2023_v39, 3  ;;  %v793_v47 = vrot.slane %v2023_v39, 2  ;;  %v789_v50 = vrot.slane %v2023_v39, 1  ;;  %v807_v3 = vrot.slane %v2023_v39, 6 }
 0x5af   :  { %v803_v58 = vrot.slane %v2023_v39, 5  ;;  %v811_v2 = vrot.slane %v2023_v39, 7 }
 0x5dc   :  { %v881_v15 = vpop.xlane.xlu1 %880 }
 0x5dd   :  { %v882_v16 = vrot.slane %v881_v15, 4 }
 0x5df   :  { %v883_v17 = vadd.f32 %v882_v16, %v881_v15 }
 0x5e1   :  { %v884_v19 = vrot.slane %v883_v17, 2 }
 0x5e3   :  { %v885_v21 = vadd.f32 %v884_v19, %v883_v17 }
 0x5e5   :  { %v886_v22 = vrot.slane %v885_v21, 1 }
 0x5e7   :  { %v887_v24 = vadd.f32 %v886_v22, %v885_v21 }
 0x5e9   :  { %v888_v25 = vmax.f32 %v887_v24, 1e-24 }
 0x5eb   :  { %1754 = vrsqrt.f32 %v888_v25  ;;  %vm895_vm4 = vweird.f32 %v888_v25 }
 0x5f1   :  { %v1755_v28 = vpop.eup %1754 }
 0x5f2   :  { %v890_v29 = vmul.f32 %v1755_v28, %v888_v25  ;;  %vm896_vm3 = vweird.f32 %v1755_v28 }
 0x5f3   :  { %vm897_vm5 = vmor %vm895_vm4, %vm896_vm3 }
 0x5f4   :  { %v891_v33 = vmul.f32 %v1755_v28, %v890_v29  ;;  %v1475_v29 = vld [vmem:[%s2257_s6] sm:$0xf] }
 0x5f6   :  { %v892_v34 = vmul.f32 0.5, %v891_v33 }
 0x5f8   :  { %v893_v38 = vsub.f32 1.5, %v892_v34 }
 0x5fa   :  { %v894_v40 = vmul.f32 %v1755_v28, %v893_v38  ;;  %v1476_v38 = vor.u32 %v1546_v32, %v1475_v29 }
 0x5fc   :  { %v898_v41 = vsel %vm897_vm5, %v1755_v28, %v894_v40  ;;  %v801_v40 = vrot.slane %v2023_v39, 4 }
 0x5fd   :  { %v2025_v45 = vmul.f32 %v898_v41, %v877_v5 }
 0x5ff   :  { %v909_v49 = vrot.slane %v2025_v45, 3  ;;  %v905_v4 = vrot.slane %v2025_v45, 2  ;;  %v901_v1 = vrot.slane %v2025_v45, 1  ;;  %v919_v53 = vrot.slane %v2025_v45, 6 }
 0x600   :  { %v915_v55 = vrot.slane %v2025_v45, 5  ;;  %v923_v61 = vrot.slane %v2025_v45, 7  ;;  %v913_v33 = vrot.slane %v2025_v45, 4 }
 0x601   :  { %v1692_v51 = vpack.i.bf16 %v797_v46, %v909_v49  ;;  %v1687_v31 = vpack.i.bf16 %v793_v47, %v905_v4  ;;  %v1682_v52 = vpack.i.bf16 %v789_v50, %v901_v1  ;;  %v1702_v59 = vpack.i.bf16 %v807_v3, %v919_v53  ;;  %v1548_v53 = vld [vmem:[%s2257_s6 + $0x14] sm:$0xf0] }
 0x602   :  { %v1697_v60 = vpack.i.bf16 %v803_v58, %v915_v55  ;;  %v1707_v5 = vpack.i.bf16 %v811_v2, %v923_v61  ;;  %v1480_v55 = vor.u32 %v1545_v42, %v1477_v43 }
 0x603   :  { %1693 = vrot.lane.b32.xlu2 %v1692_v51, %s1783_s5  ;;  %1688 = vrot.lane.b32.xlu1 %v1687_v31, %s1772_s29  ;;  %v1485_v31 = vld [vmem:[%s2257_s6 + $0x18] sm:$0xf0] }
 0x604   :  { %1683 = vrot.lane.b32.xlu0 %v1682_v52, %s1784_s23  ;;  %v1483_v52 = vld [vmem:[%s2257_s6 + $0x10] sm:$0xf] }
 0x60b   :  { %969 = vperm.xlu2 %1680, %v951_v57   ;;  %1703 = vrot.lane.b32.xlu1 %v1702_v59, %s1772_s29  ;;  %v1484_v57 = vor.u32 %v1548_v53, %v1483_v52 }
 0x60c   :  { %1698 = vrot.lane.b32.xlu0 %v1697_v60, %s1784_s23 }
 0x613   :  { %954 = vperm.xlu2 %1680, %v948_v62   ;;  %964 = vperm.xlu1 %1681, %v950_v63  }
 0x614   :  { %1708 = vrot.lane.b32.xlu0 %v1707_v5, %s1783_s5 }
 0x61b   :  { %1298 = vperm.xlu2 %1680, %v1280_v30  }
 0x61c   :  { %959 = vperm.xlu0 %1677, %v949_v6  }
 0x623   :  { %1712 = vset.pattern.permute.xlu2 %v1773_v36 }
 0x624   :  { %1293 = vperm.xlu0 %1677, %v1279_v0  }
 0x65d   :  { %v1694_v8 = vpop.permute.xlu2 %1693 }
 0x65e   :  { %v1695_v15 = vunpack.i.l.bf16 %v1694_v8  ;;  %v1696_v20 = vunpack.i.h.bf16 %v1694_v8 }
 0x665   :  { %v970_v63 = vpop.permute.xlu2 %969 }
 0x675   :  { %v1689_v7 = vpop.permute.xlu1 %1688 }
 0x676   :  { %v1691_v9 = vunpack.i.h.bf16 %v1689_v7  ;;  %v1690_v10 = vunpack.i.l.bf16 %v1689_v7  ;;  %v1684_v11 = vpop.permute.xlu0 %1683 }
 0x677   :  { %v1686_v13 = vunpack.i.h.bf16 %v1684_v11  ;;  %v1685_v14 = vunpack.i.l.bf16 %v1684_v11 }
 0x679   :  { %v815_v16 = vsel %vm103_vm2, %v2023_v39, %v1686_v13  ;;  %v927_v17 = vsel %vm103_vm2, %v2025_v45, %v1685_v14  ;;  %v955_v13 = vpop.permute.xlu2 %954 }
 0x67a   :  { %v816_v18 = vsel %vm49_vm0, %v815_v16, %v1691_v9  ;;  %v928_v19 = vsel %vm49_vm0, %v927_v17, %v1690_v10  ;;  %v1030_v17 = vld [vmem:[%s2250_s2] sm:$0xff] }
 0x67b   :  { %v929_v21 = vsel %vm817_vm6, %v928_v19, %v1695_v15  ;;  %v818_v23 = vsel %vm817_vm6, %v816_v18, %v1696_v20  ;;  %v1031_v18 = vld [vmem:[%s2250_s2 + $0x8] sm:$0xff]  ;;  %v1032_v19 = vld [vmem:[%s2250_s2 + $0x10] sm:$0xff]  ;;  %v1033_v20 = vld [vmem:[%s2250_s2 + $0x18] sm:$0xff] }
 0x67c   :  { %v935_v22 = vrot.slane %v929_v21, 7 }
 0x67d   :  { %v1704_v27 = vpop.permute.xlu1 %1703 }
 0x67e   :  { %v1699_v24 = vpop.permute.xlu0 %1698  ;;  %v940_v25 = vsel %vm939_vm7, %v818_v23, %v935_v22  ;;  %v1705_v35 = vunpack.i.l.bf16 %v1704_v27  ;;  %v1706_v46 = vunpack.i.h.bf16 %v1704_v27 }
 0x67f   :  { %v942_v26 = vpack.c.bf16 %v940_v25, %v940_v25  ;;  %v1700_v28 = vunpack.i.l.bf16 %v1699_v24  ;;  %v1701_v34 = vunpack.i.h.bf16 %v1699_v24 }
 0x681   :  { %999 = vmatpush.bf16.xpose.msra.mxu3 %v942_v26  ;;  %v930_v41 = vsel %vm103_vm2, %v913_v33, %v1700_v28  ;;  %v819_v49 = vsel %vm103_vm2, %v801_v40, %v1701_v34 }
 0x682   :  { %v931_v54 = vsel %vm49_vm0, %v930_v41, %v1705_v35  ;;  %v820_v45 = vsel %vm49_vm0, %v819_v49, %v1706_v46 }
 0x685   :  { %v965_v2 = vpop.permute.xlu1 %964 }
 0x686   :  { %v1709_v47 = vpop.permute.xlu0 %1708 }
 0x687   :  { %v1711_v4 = vunpack.i.h.bf16 %v1709_v47  ;;  %v1710_v48 = vunpack.i.l.bf16 %v1709_v47 }
 0x688   :  { %1000 = vmatmul.bf16.vlgmr.msra.gmra.mxu3 %v1476_v38 }
 0x689   :  { %1264 = vmatpush.bf16.msrb.mxu3 %v1241_v56  ;;  %v932_v56 = vsel %vm817_vm6, %v931_v54, %v1710_v48  ;;  %v821_v50 = vsel %vm817_vm6, %v820_v45, %v1711_v4 }
 0x68a   :  { %v936_v39 = vrot.slane %v932_v56, 7 }
 0x68c   :  { %v941_v1 = vsel %vm939_vm7, %v821_v50, %v936_v39 }
 0x68d   :  { %1265 = vmatpush.bf16.msrb.mxu3 %v1240_v44  ;;  %v943_v51 = vpack.c.bf16 %v941_v1, %v941_v1  ;;  %v1547_v44 = vld [vmem:[%s2257_s6 + $0x14] sm:$0xf] }
 0x68e   :  { %v1488_v3 = vor.u32 %v1547_v44, %v1485_v31  ;;  %v960_v8 = vpop.permute.xlu0 %959 }
 0x68f   :  { %1018 = vmatpush.bf16.xpose.msrb.mxu1 %v943_v51  ;;  %1662 = vmatpush.bf16.xpose.msrb.mxu2 %v943_v51 }
 0x696   :  { %1019 = vmatmul.bf16.vlgmr.msrb.gmra.mxu1 %v1480_v55  ;;  %1024 = vmatmul.bf16.vlgmr.msrb.gmra.mxu2 %v1488_v3 }
 0x698   :  { %1005 = vmatmul.bf16.gmra.mxu3 %v1484_v57 }
 0x70b   :  { %v1001_v58 = vpop.f32.mrf.mxu3 }
 0x70c   :  { %v1002_v14 = vadd.f32 %v1001_v58, %v955_v13 }
 0x713   :  { %v1003_v59 = vpop.f32.mrf.mxu3  ;;  %v1020_v62 = vpop.f32.mrf.mxu1 }
 0x714   :  { %v1004_v10 = vadd.f32 %v1003_v59, %v960_v8  ;;  %v2116_v16 = vadd.f32 %v1020_v62, %v1002_v14 }
 0x719   :  { %v1025_v60 = vpop.f32.mrf.mxu2 }
 0x71b   :  { %v1006_v61 = vpop.f32.mrf.mxu3  ;;  %v1022_v9 = vpop.f32.mrf.mxu1 }
 0x71c   :  { %v1007_v30 = vadd.f32 %v1006_v61, %v965_v2  ;;  %v2113_v15 = vadd.f32 %v1022_v9, %v1004_v10 }
 0x71e   :  { %v2110_v11 = vadd.f32 %v1025_v60, %v1007_v30 }
 0x721   :  { %v1027_v0 = vpop.f32.mrf.mxu2 }
 0x723   :  { %v1008_v5 = vpop.f32.mrf.mxu3 }
 0x724   :  { %v1009_v6 = vadd.f32 %v1008_v5, %v970_v63 }
 0x726   :  { %v2108_v7 = vadd.f32 %v1027_v0, %v1009_v6  ;;  %v1551_v0 = vld [vmem:[%s2258_s8] sm:$0xff] }
 0x727   :  { %1515 = vmatmul.msk.bf16.vlgmr.msrb.gmra.mxu3 %vm103_vm2, %v1551_v0 }
 0x728   :  { %1058 = vmatpush.msra.mxu2 %v2108_v7 }
 0x72a   :  { %1059 = vmatpush.msra.mxu2 %v2110_v11 }
 0x72c   :  { %1060 = vmatpush.msra.mxu2 %v2113_v15 }
 0x72e   :  { %1061 = vmatpush.msra.mxu2 %v2116_v16 }
 0x72f   :  { %1489 = vmatmul.msk.f32.vlgmr.msra.gmra.mxu2 %vm103_vm2, %v1030_v17 }
 0x737   :  { %1490 = vmatmul.msk.f32.gmra.mxu2 %vm103_vm2, %v1031_v18 }
 0x73f   :  { %1491 = vmatmul.msk.f32.gmra.mxu2 %vm103_vm2, %v1032_v19 }
 0x747   :  { %1492 = vmatmul.msk.f32.gmra.mxu2 %vm103_vm2, %v1033_v20 }
 0x7b2   :  { %v1063_v21 = vpop.f32.mrf.mxu2 }
 0x7b3   :  { %v1493_v22 = vmul.f32 -1.442695, %v1063_v21 }
 0x7ba   :  { %v1066_v23 = vpop.f32.mrf.mxu2 }
 0x7bb   :  { %v1494_v24 = vmul.f32 -1.442695, %v1066_v23 }
 0x7bd   :  { %1756 = vpow2.f32 %v1494_v24 }
 0x7be   :  { %1758 = vpow2.f32 %v1493_v22 }
 0x7c2   :  { %v1069_v25 = vpop.f32.mrf.mxu2 }
 0x7c3   :  { %v1757_v26 = vpop.eup %1756  ;;  %v1495_v27 = vmul.f32 -1.442695, %v1069_v25 }
 0x7c4   :  { %v1759_v28 = vpop.eup %1758  ;;  %v2136_v29 = vadd.f32 1.0, %v1757_v26 }
 0x7c5   :  { %1760 = vpow2.f32 %v1495_v27  ;;  %v2138_v32 = vadd.f32 1.0, %v1759_v28 }
 0x7c6   :  { %1762 = vrcp.f32 %v2136_v29  ;;  %vm1111_vm10 = vweird.f32 %v2136_v29  ;;  %v1115_v59 = vand.u32 2147483647, %v2136_v29  ;;  %v1117_v60 = vand.u32 2147483648, %v2136_v29 }
 0x7c7   :  { %1764 = vrcp.f32 %v2138_v32  ;;  %vm1096_vm15 = vweird.f32 %v2138_v32  ;;  %v1100_v5 = vand.u32 2147483647, %v2138_v32  ;;  %v1102_v30 = vand.u32 2147483648, %v2138_v32 }
 0x7c8   :  { %v1118_v17 = vor.u32 1.1754944e-38, %v1117_v60 }
 0x7c9   :  { %v1103_v21 = vor.u32 1.1754944e-38, %v1102_v30 }
 0x7ca   :  { %v1072_v33 = vpop.f32.mrf.mxu2 }
 0x7cb   :  { %v1761_v34 = vpop.eup %1760  ;;  %v1496_v35 = vmul.f32 -1.442695, %v1072_v33 }
 0x7cc   :  { %v1089_v38 = vadd.f32 1.0, %v1761_v34  ;;  %v1763_v40 = vpop.eup %1762 }
 0x7cd   :  { %1766 = vpow2.f32 %v1496_v35  ;;  %v2142_v41 = vpop.eup %1764  ;;  %v1107_v47 = vmul.f32 %v1763_v40, %v2136_v29  ;;  %vm1112_vm11 = vweird.f32 %v1763_v40  ;;  %v1278_v35 = vld [vmem:[%s2256_s10 + $0x8] sm:$0xff] }
 0x7ce   :  { %1768 = vrcp.f32 %v1089_v38  ;;  %v1092_v4 = vmul.f32 %v2142_v41, %v2138_v32  ;;  %v1132_v31 = vand.u32 2147483648, %v1089_v38  ;;  %vm1097_vm9 = vweird.f32 %v2142_v41  ;;  %vm2165_vm1 = vmor %vm1111_vm10, %vm1112_vm11  ;;  %v1549_v32 = vld [vmem:[%s2259_s9] sm:$0xff] }
 0x7cf   :  { %v1108_v56 = vsub.f32 1.0, %v1107_v47  ;;  %vm1126_vm12 = vweird.f32 %v1089_v38  ;;  %v1130_v53 = vand.u32 2147483647, %v1089_v38  ;;  %vm2174_vm5 = vmor %vm1096_vm15, %vm1097_vm9  ;;  %vm1101_vm9 = vcmp.eq.f32.partialorder %v1100_v5, 8.507059e+37 }
 0x7d0   :  { %v1093_v39 = vsub.f32 1.0, %v1092_v4  ;;  %v1133_v2 = vor.u32 1.1754944e-38, %v1132_v31 }
 0x7d1   :  { %v1109_v1 = vmul.f32 %v1763_v40, %v1108_v56  ;;  %vm1131_vm4 = vcmp.eq.f32.partialorder %v1130_v53, 8.507059e+37 }
 0x7d2   :  { %v1094_v42 = vmul.f32 %v2142_v41, %v1093_v39 }
 0x7d3   :  { %v1767_v46 = vpop.eup %1766  ;;  %v1110_v55 = vadd.f32 %v1763_v40, %v1109_v1 }
 0x7d4   :  { %v1769_v49 = vpop.eup %1768  ;;  %v1090_v48 = vadd.f32 1.0, %v1767_v46  ;;  %v1095_v58 = vadd.f32 %v2142_v41, %v1094_v42  ;;  %v1299_v46 = vpop.permute.xlu2 %1298 }
 0x7d5   :  { %v1122_v54 = vmul.f32 %v1769_v49, %v1089_v38  ;;  %vm1127_vm8 = vweird.f32 %v1769_v49  ;;  %v1114_v10 = vsel %vm2165_vm1, %v1763_v40, %v1110_v55  ;;  %v1277_v38 = vld [vmem:[%s2256_s10] sm:$0xff]  ;;  %v1317_v40 = vld [vmem:[%s2260_s12 + $0x10] sm:$0xff] }
 0x7d6   :  { %1770 = vrcp.f32 %v1090_v48  ;;  %v1147_v3 = vand.u32 2147483648, %v1090_v48  ;;  %vm2150_vm13 = vmor %vm1126_vm12, %vm1127_vm8  ;;  %v1145_v63 = vand.u32 2147483647, %v1090_v48  ;;  %vm1141_vm3 = vweird.f32 %v1090_v48 }
 0x7d7   :  { %v1123_v45 = vsub.f32 1.0, %v1122_v54  ;;  %v1099_v19 = vsel %vm2174_vm5, %v2142_v41, %v1095_v58  ;;  %vm1116_vm8 = vcmp.eq.f32.partialorder %v1115_v59, 8.507059e+37  ;;  %v1267_v41 = vpop.f32.mrf.mxu3  ;;  %v1318_v58 = vld [vmem:[%s2260_s12 + $0x18] sm:$0xff] }
 0x7d8   :  { %v1148_v14 = vor.u32 1.1754944e-38, %v1147_v3  ;;  %vm1146_vm7 = vcmp.eq.f32.partialorder %v1145_v63, 8.507059e+37  ;;  %v1119_v22 = vsel %vm1116_vm8, %v1118_v17, %v1114_v10  ;;  %v1104_v25 = vsel %vm1101_vm9, %v1103_v21, %v1099_v19  ;;  %v1553_v10 = vld [vmem:[%s2261_s11] sm:$0xff] }
 0x7d9   :  { %v1124_v50 = vmul.f32 %v1769_v49, %v1123_v45  ;;  %v1152_v27 = vmul.f32 %v1119_v22, %v2113_v15  ;;  %v1151_v28 = vmul.f32 %v1104_v25, %v2116_v16 }
 0x7db   :  { %v1125_v44 = vadd.f32 %v1769_v49, %v1124_v50  ;;  %v1159_v29 = vpack.c.bf16 %v1152_v27, %v1151_v28 }
 0x7dc   :  { %v1771_v51 = vpop.eup %1770 }
 0x7dd   :  { %v1137_v43 = vmul.f32 %v1771_v51, %v1090_v48  ;;  %v1129_v62 = vsel %vm2150_vm13, %v1769_v49, %v1125_v44  ;;  %vm1142_vm14 = vweird.f32 %v1771_v51  ;;  %v1294_v49 = vpop.permute.xlu0 %1293 }
 0x7de   :  { %v1134_v13 = vsel %vm1131_vm4, %v1133_v2, %v1129_v62  ;;  %vm1143_vm6 = vmor %vm1141_vm3, %vm1142_vm14 }
 0x7df   :  { %v1138_v52 = vsub.f32 1.0, %v1137_v43  ;;  %v1153_v23 = vmul.f32 %v1134_v13, %v2110_v11  ;;  %v1552_v11 = vld [vmem:[%s2258_s8 + $0x8] sm:$0xff]  ;;  %v1269_v47 = vpop.f32.mrf.mxu3  ;;  %v1315_v43 = vld [vmem:[%s2260_s12] sm:$0xff] }
 0x7e0   :  { %1516 = vmatmul.msk.bf16.gmra.mxu3 %vm103_vm2, %v1552_v11  ;;  %v1554_v13 = vld [vmem:[%s2261_s11 + $0x8] sm:$0xff] }
 0x7e1   :  { %v1139_v61 = vmul.f32 %v1771_v51, %v1138_v52 }
 0x7e3   :  { %v1140_v8 = vadd.f32 %v1771_v51, %v1139_v61 }
 0x7e5   :  { %v1144_v18 = vsel %vm1143_vm6, %v1771_v51, %v1140_v8 }
 0x7e6   :  { %v1149_v20 = vsel %vm1146_vm7, %v1148_v14, %v1144_v18 }
 0x7e7   :  { %v1154_v24 = vmul.f32 %v1149_v20, %v2108_v7  ;;  %v1550_v7 = vld [vmem:[%s2259_s9 + $0x8] sm:$0xff] }
 0x7e9   :  { %v1160_v26 = vpack.c.bf16 %v1154_v24, %v1153_v23 }
 0x7eb   :  { %1183 = vmatpush.bf16.msra.mxu0 %v1160_v26 }
 0x7ef   :  { %1184 = vmatpush.bf16.msra.mxu0 %v1159_v29 }
 0x7f2   :  { %1505 = vmatmul.msk.bf16.vlgmr.msra.gmra.mxu0 %vm103_vm2, %v1549_v32 }
 0x802   :  { %1506 = vmatmul.msk.bf16.gmra.mxu0 %vm103_vm2, %v1550_v7 }
 0x863   :  { %v1272_v54 = vpop.f32.mrf.mxu3 }
 0x86f   :  { %v1186_v15 = vpop.f32.mrf.mxu0 }
 0x870   :  { %1198 = vperm.xlu1 %1681, %v1186_v15   ;;  %1217 = vperm.xlu2 %1712, %v1186_v15  }
 0x877   :  { %v1188_v16 = vpop.f32.mrf.mxu0 }
 0x878   :  { %1203 = vperm.xlu0 %1677, %v1188_v16  }
 0x87f   :  { %v1191_v33 = vpop.f32.mrf.mxu0 }
 0x880   :  { %1208 = vperm.xlu1 %1681, %v1191_v33   ;;  %1225 = vperm.xlu2 %1712, %v1191_v33  }
 0x887   :  { %v1193_v34 = vpop.f32.mrf.mxu0 }
 0x888   :  { %1713 = vset.pattern.permute.xlu1 %v1773_v36  ;;  %1213 = vperm.xlu0 %1677, %v1193_v34   ;;  %v1316_v36 = vld [vmem:[%s2260_s12 + $0x8] sm:$0xff] }
 0x889   :  { %1229 = vperm.xlu1 %1713, %v1193_v34   ;;  %1714 = vset.pattern.permute.xlu2 %v1774_v37 }
 0x88a   :  { %1288 = vperm.xlu2 %1714, %v1278_v35  }
 0x890   :  { %1283 = vperm.xlu0 %1677, %v1277_v38  }
 0x891   :  { %1221 = vperm.xlu1 %1713, %v1188_v16  }
 0x892   :  { %1331 = vperm.xlu2 %1714, %v1317_v40  }
 0x898   :  { %1326 = vperm.xlu0 %1677, %v1316_v36  }
 0x899   :  { %1715 = vset.pattern.permute.xlu1 %v1774_v37  ;;  %v1274_v37 = vpop.f32.mrf.mxu3 }
 0x89a   :  { %1321 = vperm.xlu1 %1715, %v1315_v43  }
 0x8a2   :  { %1336 = vperm.xlu1 %1715, %v1318_v58  }
 0x8ca   :  { %v1218_v48 = vpop.permute.xlu2 %1217 }
 0x8da   :  { %v1226_v39 = vpop.permute.xlu2 %1225 }
 0x8e2   :  { %v1199_v4 = vpop.permute.xlu1 %1198 }
 0x8e3   :  { %v1232_v55 = vsel %vm49_vm0, %v1199_v4, %v1218_v48 }
 0x8e4   :  { %v1268_v61 = vadd.f32 %v1267_v41, %v1232_v55  ;;  %v1289_v30 = vpop.permute.xlu2 %1288 }
 0x8ea   :  { %v1204_v56 = vpop.permute.xlu0 %1203 }
 0x8ec   :  { %v1332_v26 = vpop.permute.xlu2 %1331 }
 0x8f2   :  { %v1209_v45 = vpop.permute.xlu1 %1208 }
 0x8f3   :  { %v1234_v50 = vsel %vm49_vm0, %v1209_v45, %v1226_v39 }
 0x8f4   :  { %v1273_v1 = vadd.f32 %v1272_v54, %v1234_v50 }
 0x8f6   :  { %v1303_v31 = vadd.f32 %v1294_v49, %v1273_v1 }
 0x8f8   :  { %v1307_v3 = vmax.f32 %v1303_v31, 0.0 }
 0x8fa   :  { %v1214_v51 = vpop.permute.xlu0 %1213 }
 0x8fb   :  { %v1230_v42 = vpop.permute.xlu1 %1229 }
 0x8fc   :  { %v1235_v44 = vsel %vm49_vm0, %v1214_v51, %v1230_v42 }
 0x8fd   :  { %v1275_v52 = vadd.f32 %v1274_v37, %v1235_v44 }
 0x8ff   :  { %v1304_v53 = vadd.f32 %v1299_v46, %v1275_v52 }
 0x901   :  { %v1308_v57 = vmax.f32 %v1304_v53, 0.0 }
 0x902   :  { %v1284_v59 = vpop.permute.xlu0 %1283 }
 0x903   :  { %v1314_v60 = vpack.c.bf16 %v1308_v57, %v1307_v3  ;;  %v1222_v62 = vpop.permute.xlu1 %1221  ;;  %v1301_v2 = vadd.f32 %v1284_v59, %v1268_v61 }
 0x904   :  { %v1233_v63 = vsel %vm49_vm0, %v1204_v56, %v1222_v62 }
 0x905   :  { %v1270_v5 = vadd.f32 %v1269_v47, %v1233_v63  ;;  %1361 = vmatpush.bf16.msra.mxu1 %v1314_v60  ;;  %v1305_v0 = vmax.f32 %v1301_v2, 0.0 }
 0x907   :  { %v1302_v6 = vadd.f32 %v1289_v30, %v1270_v5 }
 0x909   :  { %v1306_v8 = vmax.f32 %v1302_v6, 0.0 }
 0x90a   :  { %v1327_v21 = vpop.permute.xlu0 %1326 }
 0x90b   :  { %v1313_v9 = vpack.c.bf16 %v1306_v8, %v1305_v0 }
 0x90c   :  { %v1322_v14 = vpop.permute.xlu1 %1321 }
 0x90d   :  { %1362 = vmatpush.bf16.msra.mxu1 %v1313_v9 }
 0x910   :  { %1525 = vmatmul.msk.bf16.vlgmr.msra.gmra.mxu1 %vm103_vm2, %v1553_v10 }
 0x914   :  { %v1337_v11 = vpop.permute.xlu1 %1336 }
 0x920   :  { %1526 = vmatmul.msk.bf16.gmra.mxu1 %vm103_vm2, %v1554_v13 }
 0x98d   :  { %v1364_v17 = vpop.f32.mrf.mxu1 }
 0x98e   :  { %v1365_v18 = vadd.f32 %v1364_v17, %v1322_v14 }
 0x990   :  { %v1374_v19 = vmax.f32 %v1365_v18, 0.0 }
 0x992   :  { %v1378_v20 = vmul.f32 %v2007_v12, %v1374_v19 }
 0x994   :  { %1382 = vst [vmem:[%s2262_s13] sm:$0xff] %v1378_v20 }
 0x995   :  { %v1366_v22 = vpop.f32.mrf.mxu1 }
 0x996   :  { %v1367_v23 = vadd.f32 %v1366_v22, %v1327_v21 }
 0x998   :  { %v1375_v24 = vmax.f32 %v1367_v23, 0.0 }
 0x99a   :  { %v1379_v25 = vmul.f32 %v2007_v12, %v1375_v24 }
 0x99c   :  { %1383 = vst [vmem:[%s2262_s13 + $0x8] sm:$0xff] %v1379_v25 }
 0x99d   :  { %v1369_v27 = vpop.f32.mrf.mxu1 }
 0x99e   :  { %v1370_v28 = vadd.f32 %v1369_v27, %v1332_v26 }
 0x9a0   :  { %v1376_v29 = vmax.f32 %v1370_v28, 0.0 }
 0x9a2   :  { %v1380_v32 = vmul.f32 %v2007_v12, %v1376_v29 }
 0x9a4   :  { %1384 = vst [vmem:[%s2262_s13 + $0x10] sm:$0xff] %v1380_v32 }
 0x9a5   :  { %v1371_v7 = vpop.f32.mrf.mxu1 }
 0x9a6   :  { %v1372_v15 = vadd.f32 %v1371_v7, %v1337_v11 }
 0x9a8   :  { %v1377_v16 = vmax.f32 %v1372_v15, 0.0 }
 0x9aa   :  { %v1381_v33 = vmul.f32 %v2007_v12, %v1377_v16 }
 0x9ac   :  { %1385 = vst [vmem:[%s2262_s13 + $0x18] sm:$0xff] %v1381_v33 }

</bundles_post_ra>
